<compile_context>
chip_gen: v7x
topology: tpu7x:2x2x1
jax: 0.10.0
libtpu: 0.0.40
codegen_flags: <defaults>
</compile_context>

<pallas_src>
import functools

import jax
import jax.numpy as jnp
from jax.experimental import pallas as pl
from jax.experimental.pallas import tpu as pltpu

TAU_MEM = 50.0
DT = 1.0
LN_EPS = 1e-5
ROW_ALIGN = 16          # batch-tile row alignment (bf16 sublane packing safe)
UNROLL_T_MAX = 16       # fully unroll the time loop up to this length


def _round_up(x, m):
    return ((x + m - 1) // m) * m


# ----------------------------------------------------------------------------- #
# Pallas kernel: encoder + T-step LeakyRNN (layer-norm) + mu head, one batch tile
# ----------------------------------------------------------------------------- #
def actor_kernel(*refs, seq_len, alpha, has_state, matmul_dtype):
    if has_state:
        (obs_ref, h0_ref, we_ref, be_ref, wih_ref, whh_ref, brnn_ref,
         ln_g_ref, ln_b_ref, wmu_ref, bmu_ref,
         mu_ref, hn_ref, feed_ref) = refs
    else:
        (obs_ref, we_ref, be_ref, wih_ref, whh_ref, brnn_ref,
         ln_g_ref, ln_b_ref, wmu_ref, bmu_ref,
         mu_ref, hn_ref, feed_ref) = refs
        h0_ref = None

    tb = mu_ref.shape[0]
    H = hn_ref.shape[1]

    # Weights stay VMEM-resident across grid steps (constant index_map).
    we, wih, whh = we_ref[...], wih_ref[...], whh_ref[...]

    # Hoisted broadcasts: JAX does not CSE broadcast_in_dim, so with the time
    # loop unrolled each of these would otherwise be re-emitted every step.
    be_b = jnp.broadcast_to(be_ref[...], (tb, be_ref.shape[1]))
    brnn_b = jnp.broadcast_to(brnn_ref[...], (tb, H))
    ln_g_b = jnp.broadcast_to(ln_g_ref[...], (tb, H))
    ln_b_b = jnp.broadcast_to(ln_b_ref[...], (tb, H))

    # --- Recurrence-independent work, hoisted off the serial critical path --- #
    # Encoder + input projection for every timestep into the feed scratch
    # (T, tb, H); these matmuls carry no dependence on h and can be freely
    # pipelined by the scheduler before/around the recurrence.
    def project(t):
        x_t = obs_ref[t]                                         # (tb, D) bf16
        enc = jnp.dot(x_t, we, preferred_element_type=jnp.float32) + be_b
        enc = jnp.maximum(enc, 0.0)                              # (tb, E_pad) f32
        feed_ref[t] = jnp.dot(enc.astype(matmul_dtype), wih,
                              preferred_element_type=jnp.float32)

    # --- Serial LeakyRNN recurrence (the only true dependency chain) --------- #
    inv_h = 1.0 / float(H)

    def step(t, h):
        pre = (feed_ref[t]
               + jnp.dot(h.astype(matmul_dtype), whh,
                         preferred_element_type=jnp.float32)
               + brnn_b)                                         # (tb, H) f32
        # LayerNorm via independent sum / sum-of-squares reductions.
        s1 = jnp.sum(pre, axis=-1, keepdims=True)
        s2 = jnp.sum(pre * pre, axis=-1, keepdims=True)
        mean = s1 * inv_h
        var = jnp.maximum(s2 * inv_h - mean * mean, 0.0)
        nrm = (pre - mean) * jax.lax.rsqrt(var + LN_EPS) * ln_g_b + ln_b_b
        # Leaky integration (elementwise in f32).
        return (1.0 - alpha) * h + alpha * jnp.tanh(nrm)

    h = (h0_ref[...].astype(jnp.float32) if has_state
         else jnp.zeros((tb, H), jnp.float32))

    if seq_len <= UNROLL_T_MAX:
        for t in range(seq_len):                # static unroll, static slices
            project(t)
        for t in range(seq_len):
            h = step(t, h)
    else:
        # Long sequences: bound live ranges / code size with fori_loop.
        def project_body(t, carry):
            project(t)
            return carry
        jax.lax.fori_loop(0, seq_len, project_body, 0)
        h = jax.lax.fori_loop(0, seq_len, step, h)

    hn_ref[...] = h.astype(hn_ref.dtype)                         # (tb, H)

    # mu head: lane-dense padded (tb, A_pad) output; padded cols are exactly
    # zero and are sliced off in the wrapper.
    mu = jnp.dot(h.astype(matmul_dtype), wmu_ref[...],
                 preferred_element_type=jnp.float32) + bmu_ref[...]
    mu_ref[...] = mu.astype(mu_ref.dtype)


# ----------------------------------------------------------------------------- #
# One-time host-side parameter padding / casting (lane-dense, MXU-friendly)
# ----------------------------------------------------------------------------- #
def _prepare_params(params, matmul_dtype):
    D, E = params["we"].shape
    H = params["whh"].shape[0]
    A = params["wmu"].shape[1]
    E_pad = _round_up(E, 128)
    A_pad = _round_up(A, 128)

    return dict(
        we=jnp.pad(params["we"], ((0, 0), (0, E_pad - E))).astype(matmul_dtype),
        be=jnp.pad(params["be"].reshape(1, E),
                   ((0, 0), (0, E_pad - E))).astype(jnp.float32),
        wih=jnp.pad(params["wih"], ((0, E_pad - E), (0, 0))).astype(matmul_dtype),
        whh=params["whh"].astype(matmul_dtype),
        brnn=params["brnn"].reshape(1, H).astype(jnp.float32),
        ln_g=params["ln_g"].reshape(1, H).astype(jnp.float32),
        ln_b=params["ln_b"].reshape(1, H).astype(jnp.float32),
        wmu=jnp.pad(params["wmu"], ((0, 0), (0, A_pad - A))).astype(matmul_dtype),
        bmu=jnp.pad(params["bmu"].reshape(1, A),
                    ((0, 0), (0, A_pad - A))).astype(jnp.float32),
    )


# ----------------------------------------------------------------------------- #
# Wrapper: tiling, BlockSpecs, pallas_call, head slicing, sigma
# ----------------------------------------------------------------------------- #
def actor_forward(obs, params, state=None, *, tile_b=512,
                  matmul_dtype=jnp.bfloat16):
    obs = jnp.asarray(obs, jnp.float32)
    if obs.ndim == 2:                      # matches encoded.unsqueeze(1) path
        obs = obs[:, None, :]
    B, T, D = obs.shape
    H = params["whh"].shape[0]
    A = params["wmu"].shape[1]
    alpha = DT / TAU_MEM
    has_state = state is not None

    p = _prepare_params(params, matmul_dtype)
    E_pad = p["we"].shape[1]
    A_pad = p["wmu"].shape[1]

    # --- Batch tiling -------------------------------------------------------- #
    tile_b = _round_up(tile_b, ROW_ALIGN)
    tb = min(tile_b, _round_up(B, ROW_ALIGN))
    B_pad = _round_up(B, tb)
    n_tiles = B_pad // tb
    # v7x megacore: make sure there are >= 2 "parallel" grid tiles whenever the
    # batch is big enough that splitting keeps both tiles non-trivially full.
    if n_tiles == 1 and B >= 2 * ROW_ALIGN:
        tb = _round_up(pl.cdiv(B_pad, 2), ROW_ALIGN)
        B_pad = _round_up(B, tb)
        n_tiles = B_pad // tb

    # obs: bf16, time-major (T, B_pad, D) so per-timestep tiles are contiguous.
    obs_p = jnp.pad(obs.astype(matmul_dtype),
                    ((0, B_pad - B), (0, 0), (0, 0)))
    obs_tm = jnp.transpose(obs_p, (1, 0, 2))                    # (T, B_pad, D)

    const2 = lambda i: (0, 0)
    in_specs = [pl.BlockSpec((T, tb, D), lambda i: (0, i, 0))]  # obs, streamed
    inputs = [obs_tm]

    if has_state:                           # batch-first state (B, num_layers, H)
        h0 = jnp.pad(jnp.asarray(state, jnp.float32)[:, 0, :],
                     ((0, B_pad - B), (0, 0)))
        in_specs.append(pl.BlockSpec((tb, H), lambda i: (i, 0)))
        inputs.append(h0)
    # else: no h0 DMA at all — h is zeroed inside the kernel.

    for name in ("we", "be", "wih", "whh", "brnn", "ln_g", "ln_b", "wmu", "bmu"):
        in_specs.append(pl.BlockSpec(p[name].shape, const2))    # VMEM-resident
        inputs.append(p[name])

    out_specs = [
        pl.BlockSpec((tb, A_pad), lambda i: (i, 0)),            # mu (lane-dense)
        pl.BlockSpec((tb, H), lambda i: (i, 0)),                # h_n
    ]
    out_shape = (jax.ShapeDtypeStruct((B_pad, A_pad), jnp.float32),
                 jax.ShapeDtypeStruct((B_pad, H), jnp.float32))

    param_bytes = sum(int(v.size) * v.dtype.itemsize for v in p.values())
    cost = pl.CostEstimate(
        flops=2 * B_pad * T * (D * E_pad + E_pad * H + H * H)
              + 2 * B_pad * H * A_pad,
        transcendentals=B_pad * T * (H + 1),
        bytes_accessed=int(obs_tm.size) * obs_tm.dtype.itemsize + param_bytes
                       + B_pad * (A_pad + H) * 4
                       + (B_pad * H * 4 if has_state else 0),
    )

    kernel = functools.partial(actor_kernel, seq_len=T, alpha=alpha,
                               has_state=has_state, matmul_dtype=matmul_dtype)

    mu_pad, hn = pl.pallas_call(
        kernel,
        out_shape=out_shape,
        grid_spec=pltpu.PrefetchScalarGridSpec(
            num_scalar_prefetch=0,
            grid=(n_tiles,),
            in_specs=in_specs,
            out_specs=out_specs,
            scratch_shapes=[pltpu.VMEM((T, tb, H), jnp.float32)]),  # feed
        compiler_params=pltpu.CompilerParams(
            dimension_semantics=("parallel",),        # v7x: tiles over 2 TCs
            vmem_limit_bytes=32 * 1024 * 1024),       # safe on v5e/v6e/v7x
        cost_estimate=cost,
    )(*inputs)

    mu = mu_pad[:B, :A]
    h_n = hn[:B].reshape(B, 1, H)                     # batch-first (B, layers, H)
    sigma = jnp.broadcast_to(jax.nn.softplus(params["sigma"]) + 0.001, mu.shape)
    return (mu, sigma), h_n


# ----------------------------------------------------------------------------- #
# Pure-JAX reference (same math, same bf16-in / f32-accumulate matmuls)
# ----------------------------------------------------------------------------- #
def actor_reference(obs, params, state=None, matmul_dtype=jnp.bfloat16):
    obs = jnp.asarray(obs, jnp.float32)
    if obs.ndim == 2:
        obs = obs[:, None, :]
    B, T, D = obs.shape
    H = params["whh"].shape[0]
    alpha = DT / TAU_MEM

    we = params["we"].astype(matmul_dtype)
    wih = params["wih"].astype(matmul_dtype)
    whh = params["whh"].astype(matmul_dtype)
    wmu = params["wmu"].astype(matmul_dtype)

    h = (jnp.zeros((B, H), jnp.float32) if state is None
         else jnp.asarray(state, jnp.float32)[:, 0, :])
    for t in range(T):
        x_t = obs[:, t, :]
        enc = jnp.maximum(
            jnp.dot(x_t.astype(matmul_dtype), we,
                    preferred_element_type=jnp.float32) + params["be"], 0.0)
        pre = (jnp.dot(enc.astype(matmul_dtype), wih,
                       preferred_element_type=jnp.float32)
               + jnp.dot(h.astype(matmul_dtype), whh,
                         preferred_element_type=jnp.float32)
               + params["brnn"])
        mean = jnp.mean(pre, axis=-1, keepdims=True)
        var = jnp.mean(jnp.square(pre - mean), axis=-1, keepdims=True)
        pre = (pre - mean) * jax.lax.rsqrt(var + LN_EPS) * params["ln_g"] + params["ln_b"]
        h = (1.0 - alpha) * h + alpha * jnp.tanh(pre)

    mu = jnp.dot(h.astype(matmul_dtype), wmu,
                 preferred_element_type=jnp.float32) + params["bmu"]
    sigma = jnp.broadcast_to(jax.nn.softplus(params["sigma"]) + 0.001, mu.shape)
    return (mu, sigma), h.reshape(B, 1, H)


# ----------------------------------------------------------------------------- #
# Deterministic parameter initialization (shapes implied by the module)
# ----------------------------------------------------------------------------- #
def init_params(key, obs_dim, action_dim, encoded_dim=40, hidden_size=128):
    def uniform(k, shape, fan_in):
        bound = 1.0 / float(fan_in) ** 0.5
        return jax.random.uniform(k, shape, jnp.float32, -bound, bound)

    ks = jax.random.split(key, 7)
    return dict(
        we=uniform(ks[0], (obs_dim, encoded_dim), obs_dim),           # encoder
        be=uniform(ks[1], (encoded_dim,), obs_dim),
        wih=uniform(ks[2], (encoded_dim, hidden_size), encoded_dim),  # LeakyRNN
        whh=uniform(ks[3], (hidden_size, hidden_size), hidden_size),
        brnn=uniform(ks[4], (hidden_size,), hidden_size),
        ln_g=jnp.ones((hidden_size,), jnp.float32),
        ln_b=jnp.zeros((hidden_size,), jnp.float32),
        wmu=uniform(ks[5], (hidden_size, action_dim), hidden_size),   # mu head
        bmu=uniform(ks[6], (action_dim,), hidden_size),
        sigma=jnp.zeros((action_dim,), jnp.float32),                  # nn.Parameter
    )


if __name__ == "__main__":
    key = jax.random.PRNGKey(0)
    k_obs, k_par, k_state = jax.random.split(key, 3)

    batch, seq, obs_dim, action_dim, hidden = 2, 8, 16, 2, 128
    obs = jax.random.normal(k_obs, (batch, seq, obs_dim), jnp.float32)
    params = init_params(k_par, obs_dim, action_dim,
                         encoded_dim=40, hidden_size=hidden)

    # --- state=None inference path (no h0 DMA) ------------------------------ #
    (mu, sigma), h_n = actor_forward(obs, params, state=None)
    mu, sigma, h_n = jax.block_until_ready((mu, sigma, h_n))
    (mu_ref, sigma_ref), h_ref = actor_reference(obs, params, state=None)

    assert mu.shape == (batch, action_dim)
    assert sigma.shape == (batch, action_dim)
    assert h_n.shape == (batch, 1, hidden)
    assert jnp.allclose(mu, mu_ref, atol=2e-3, rtol=2e-3)
    assert jnp.allclose(sigma, sigma_ref, atol=1e-6, rtol=1e-6)
    assert jnp.allclose(h_n, h_ref, atol=2e-3, rtol=2e-3)

    # --- with a provided batch-first state (B, num_layers, H) --------------- #
    state0 = 0.1 * jax.random.normal(k_state, (batch, 1, hidden), jnp.float32)
    (mu_s, sigma_s), h_ns = actor_forward(obs, params, state=state0)
    mu_s, h_ns = jax.block_until_ready((mu_s, h_ns))
    (mu_sr, _), h_nsr = actor_reference(obs, params, state=state0)

    assert jnp.allclose(mu_s, mu_sr, atol=2e-3, rtol=2e-3)
    assert jnp.allclose(h_ns, h_nsr, atol=2e-3, rtol=2e-3)

    print("KERNEL_OK")
</pallas_src>

<mosaic_0001>
module attributes {stable_mosaic.version = 11 : i64} {
  func.func @actor_kernel(%arg0: i32, %arg1: memref<8x16x16xbf16, #tpu.memory_space<vmem>>, %arg2: memref<16x128xbf16, #tpu.memory_space<vmem>>, %arg3: memref<1x128xf32, #tpu.memory_space<vmem>>, %arg4: memref<128x128xbf16, #tpu.memory_space<vmem>>, %arg5: memref<128x128xbf16, #tpu.memory_space<vmem>>, %arg6: memref<1x128xf32, #tpu.memory_space<vmem>>, %arg7: memref<1x128xf32, #tpu.memory_space<vmem>>, %arg8: memref<1x128xf32, #tpu.memory_space<vmem>>, %arg9: memref<128x128xbf16, #tpu.memory_space<vmem>>, %arg10: memref<1x128xf32, #tpu.memory_space<vmem>>, %arg11: memref<16x128xf32, #tpu.memory_space<vmem>>, %arg12: memref<16x128xf32, #tpu.memory_space<vmem>>, %arg13: memref<8x16x128xf32, #tpu.memory_space<vmem>>) attributes {dimension_semantics = [#tpu.dimension_semantics<parallel>], iteration_bounds = array<i64: 1>, scalar_prefetch = 0 : i64, scratch_operands = 1 : i64, tpu.core_type = #tpu.core_type<tc>, window_params = [{transform_indices = @transform_0, window_bounds = array<i64: 8, 16, 16>}, {pipeline_mode = #tpu.pipeline_mode<synchronous>, transform_indices = @transform_1, window_bounds = array<i64: 16, 128>}, {pipeline_mode = #tpu.pipeline_mode<synchronous>, transform_indices = @transform_2, window_bounds = array<i64: 1, 128>}, {pipeline_mode = #tpu.pipeline_mode<synchronous>, transform_indices = @transform_3, window_bounds = array<i64: 128, 128>}, {pipeline_mode = #tpu.pipeline_mode<synchronous>, transform_indices = @transform_4, window_bounds = array<i64: 128, 128>}, {pipeline_mode = #tpu.pipeline_mode<synchronous>, transform_indices = @transform_5, window_bounds = array<i64: 1, 128>}, {pipeline_mode = #tpu.pipeline_mode<synchronous>, transform_indices = @transform_6, window_bounds = array<i64: 1, 128>}, {pipeline_mode = #tpu.pipeline_mode<synchronous>, transform_indices = @transform_7, window_bounds = array<i64: 1, 128>}, {pipeline_mode = #tpu.pipeline_mode<synchronous>, transform_indices = @transform_8, window_bounds = array<i64: 128, 128>}, {pipeline_mode = #tpu.pipeline_mode<synchronous>, transform_indices = @transform_9, window_bounds = array<i64: 1, 128>}, {transform_indices = @transform_10, window_bounds = array<i64: 16, 128>}, {transform_indices = @transform_11, window_bounds = array<i64: 16, 128>}]} {
    %c0 = arith.constant 0 : index
    %c0_0 = arith.constant 0 : index
    %0 = vector.load %arg2[%c0, %c0_0] : memref<16x128xbf16, #tpu.memory_space<vmem>>, vector<16x128xbf16>
    %c0_1 = arith.constant 0 : index
    %c0_2 = arith.constant 0 : index
    %1 = vector.load %arg4[%c0_1, %c0_2] : memref<128x128xbf16, #tpu.memory_space<vmem>>, vector<128x128xbf16>
    %c0_3 = arith.constant 0 : index
    %c0_4 = arith.constant 0 : index
    %2 = vector.load %arg5[%c0_3, %c0_4] : memref<128x128xbf16, #tpu.memory_space<vmem>>, vector<128x128xbf16>
    %c0_5 = arith.constant 0 : index
    %c0_6 = arith.constant 0 : index
    %3 = vector.load %arg3[%c0_5, %c0_6] : memref<1x128xf32, #tpu.memory_space<vmem>>, vector<1x128xf32>
    %4 = vector.shape_cast %3 : vector<1x128xf32> to vector<1x128xf32>
    %5 = vector.broadcast %4 : vector<1x128xf32> to vector<16x128xf32>
    %c0_7 = arith.constant 0 : index
    %c0_8 = arith.constant 0 : index
    %6 = vector.load %arg6[%c0_7, %c0_8] : memref<1x128xf32, #tpu.memory_space<vmem>>, vector<1x128xf32>
    %7 = vector.shape_cast %6 : vector<1x128xf32> to vector<1x128xf32>
    %8 = vector.broadcast %7 : vector<1x128xf32> to vector<16x128xf32>
    %c0_9 = arith.constant 0 : index
    %c0_10 = arith.constant 0 : index
    %9 = vector.load %arg7[%c0_9, %c0_10] : memref<1x128xf32, #tpu.memory_space<vmem>>, vector<1x128xf32>
    %10 = vector.shape_cast %9 : vector<1x128xf32> to vector<1x128xf32>
    %11 = vector.broadcast %10 : vector<1x128xf32> to vector<16x128xf32>
    %c0_11 = arith.constant 0 : index
    %c0_12 = arith.constant 0 : index
    %12 = vector.load %arg8[%c0_11, %c0_12] : memref<1x128xf32, #tpu.memory_space<vmem>>, vector<1x128xf32>
    %13 = vector.shape_cast %12 : vector<1x128xf32> to vector<1x128xf32>
    %14 = vector.broadcast %13 : vector<1x128xf32> to vector<16x128xf32>
    %cst = arith.constant 0.000000e+00 : f32
    %15 = vector.broadcast %cst : f32 to vector<16x128xf32>
    %c0_13 = arith.constant 0 : index
    %c0_14 = arith.constant 0 : index
    %c0_15 = arith.constant 0 : index
    %16 = vector.load %arg1[%c0_13, %c0_14, %c0_15] : memref<8x16x16xbf16, #tpu.memory_space<vmem>>, vector<1x16x16xbf16>
    %17 = vector.shape_cast %16 : vector<1x16x16xbf16> to vector<16x16xbf16>
    %cst_16 = arith.constant dense<0.000000e+00> : vector<16x128xf32>
    %18 = tpu.matmul %17, %0, %cst_16 {dimension_numbers = #tpu.dot_dimension_numbers<[1], [0], [0], [1], [0, 0, 1, 1], [], []>} : vector<16x16xbf16>, vector<16x128xbf16>, vector<16x128xf32> -> vector<16x128xf32>
    %19 = arith.addf %18, %5 : vector<16x128xf32>
    %cst_17 = arith.constant 0.000000e+00 : f32
    %20 = vector.broadcast %cst_17 : f32 to vector<16x128xf32>
    %21 = arith.maximumf %19, %20 : vector<16x128xf32>
    %22 = arith.truncf %21 : vector<16x128xf32> to vector<16x128xbf16>
    %cst_18 = arith.constant dense<0.000000e+00> : vector<16x128xf32>
    %23 = tpu.matmul %22, %1, %cst_18 {dimension_numbers = #tpu.dot_dimension_numbers<[1], [0], [0], [1], [0, 0, 1, 1], [], []>} : vector<16x128xbf16>, vector<128x128xbf16>, vector<16x128xf32> -> vector<16x128xf32>
    %c0_19 = arith.constant 0 : index
    %c0_20 = arith.constant 0 : index
    %c0_21 = arith.constant 0 : index
    %24 = vector.load %arg13[%c0_19, %c0_20, %c0_21] : memref<8x16x128xf32, #tpu.memory_space<vmem>>, vector<1x16x128xf32>
    %25 = vector.shape_cast %24 : vector<1x16x128xf32> to vector<16x128xf32>
    %26 = vector.shape_cast %23 : vector<16x128xf32> to vector<1x16x128xf32>
    tpu.vector_store %arg13[%c0_19, %c0_20, %c0_21], %26 {strides = array<i32>} : memref<8x16x128xf32, #tpu.memory_space<vmem>>, vector<1x16x128xf32>,
    %c1 = arith.constant 1 : index
    %c0_22 = arith.constant 0 : index
    %c0_23 = arith.constant 0 : index
    %27 = vector.load %arg1[%c1, %c0_22, %c0_23] : memref<8x16x16xbf16, #tpu.memory_space<vmem>>, vector<1x16x16xbf16>
    %28 = vector.shape_cast %27 : vector<1x16x16xbf16> to vector<16x16xbf16>
    %cst_24 = arith.constant dense<0.000000e+00> : vector<16x128xf32>
    %29 = tpu.matmul %28, %0, %cst_24 {dimension_numbers = #tpu.dot_dimension_numbers<[1], [0], [0], [1], [0, 0, 1, 1], [], []>} : vector<16x16xbf16>, vector<16x128xbf16>, vector<16x128xf32> -> vector<16x128xf32>
    %30 = arith.addf %29, %5 : vector<16x128xf32>
    %cst_25 = arith.constant 0.000000e+00 : f32
    %31 = vector.broadcast %cst_25 : f32 to vector<16x128xf32>
    %32 = arith.maximumf %30, %31 : vector<16x128xf32>
    %33 = arith.truncf %32 : vector<16x128xf32> to vector<16x128xbf16>
    %cst_26 = arith.constant dense<0.000000e+00> : vector<16x128xf32>
    %34 = tpu.matmul %33, %1, %cst_26 {dimension_numbers = #tpu.dot_dimension_numbers<[1], [0], [0], [1], [0, 0, 1, 1], [], []>} : vector<16x128xbf16>, vector<128x128xbf16>, vector<16x128xf32> -> vector<16x128xf32>
    %c1_27 = arith.constant 1 : index
    %c0_28 = arith.constant 0 : index
    %c0_29 = arith.constant 0 : index
    %35 = vector.load %arg13[%c1_27, %c0_28, %c0_29] : memref<8x16x128xf32, #tpu.memory_space<vmem>>, vector<1x16x128xf32>
    %36 = vector.shape_cast %35 : vector<1x16x128xf32> to vector<16x128xf32>
    %37 = vector.shape_cast %34 : vector<16x128xf32> to vector<1x16x128xf32>
    tpu.vector_store %arg13[%c1_27, %c0_28, %c0_29], %37 {strides = array<i32>} : memref<8x16x128xf32, #tpu.memory_space<vmem>>, vector<1x16x128xf32>,
    %c2 = arith.constant 2 : index
    %c0_30 = arith.constant 0 : index
    %c0_31 = arith.constant 0 : index
    %38 = vector.load %arg1[%c2, %c0_30, %c0_31] : memref<8x16x16xbf16, #tpu.memory_space<vmem>>, vector<1x16x16xbf16>
    %39 = vector.shape_cast %38 : vector<1x16x16xbf16> to vector<16x16xbf16>
    %cst_32 = arith.constant dense<0.000000e+00> : vector<16x128xf32>
    %40 = tpu.matmul %39, %0, %cst_32 {dimension_numbers = #tpu.dot_dimension_numbers<[1], [0], [0], [1], [0, 0, 1, 1], [], []>} : vector<16x16xbf16>, vector<16x128xbf16>, vector<16x128xf32> -> vector<16x128xf32>
    %41 = arith.addf %40, %5 : vector<16x128xf32>
    %cst_33 = arith.constant 0.000000e+00 : f32
    %42 = vector.broadcast %cst_33 : f32 to vector<16x128xf32>
    %43 = arith.maximumf %41, %42 : vector<16x128xf32>
    %44 = arith.truncf %43 : vector<16x128xf32> to vector<16x128xbf16>
    %cst_34 = arith.constant dense<0.000000e+00> : vector<16x128xf32>
    %45 = tpu.matmul %44, %1, %cst_34 {dimension_numbers = #tpu.dot_dimension_numbers<[1], [0], [0], [1], [0, 0, 1, 1], [], []>} : vector<16x128xbf16>, vector<128x128xbf16>, vector<16x128xf32> -> vector<16x128xf32>
    %c2_35 = arith.constant 2 : index
    %c0_36 = arith.constant 0 : index
    %c0_37 = arith.constant 0 : index
    %46 = vector.load %arg13[%c2_35, %c0_36, %c0_37] : memref<8x16x128xf32, #tpu.memory_space<vmem>>, vector<1x16x128xf32>
    %47 = vector.shape_cast %46 : vector<1x16x128xf32> to vector<16x128xf32>
    %48 = vector.shape_cast %45 : vector<16x128xf32> to vector<1x16x128xf32>
    tpu.vector_store %arg13[%c2_35, %c0_36, %c0_37], %48 {strides = array<i32>} : memref<8x16x128xf32, #tpu.memory_space<vmem>>, vector<1x16x128xf32>,
    %c3 = arith.constant 3 : index
    %c0_38 = arith.constant 0 : index
    %c0_39 = arith.constant 0 : index
    %49 = vector.load %arg1[%c3, %c0_38, %c0_39] : memref<8x16x16xbf16, #tpu.memory_space<vmem>>, vector<1x16x16xbf16>
    %50 = vector.shape_cast %49 : vector<1x16x16xbf16> to vector<16x16xbf16>
    %cst_40 = arith.constant dense<0.000000e+00> : vector<16x128xf32>
    %51 = tpu.matmul %50, %0, %cst_40 {dimension_numbers = #tpu.dot_dimension_numbers<[1], [0], [0], [1], [0, 0, 1, 1], [], []>} : vector<16x16xbf16>, vector<16x128xbf16>, vector<16x128xf32> -> vector<16x128xf32>
    %52 = arith.addf %51, %5 : vector<16x128xf32>
    %cst_41 = arith.constant 0.000000e+00 : f32
    %53 = vector.broadcast %cst_41 : f32 to vector<16x128xf32>
    %54 = arith.maximumf %52, %53 : vector<16x128xf32>
    %55 = arith.truncf %54 : vector<16x128xf32> to vector<16x128xbf16>
    %cst_42 = arith.constant dense<0.000000e+00> : vector<16x128xf32>
    %56 = tpu.matmul %55, %1, %cst_42 {dimension_numbers = #tpu.dot_dimension_numbers<[1], [0], [0], [1], [0, 0, 1, 1], [], []>} : vector<16x128xbf16>, vector<128x128xbf16>, vector<16x128xf32> -> vector<16x128xf32>
    %c3_43 = arith.constant 3 : index
    %c0_44 = arith.constant 0 : index
    %c0_45 = arith.constant 0 : index
    %57 = vector.load %arg13[%c3_43, %c0_44, %c0_45] : memref<8x16x128xf32, #tpu.memory_space<vmem>>, vector<1x16x128xf32>
    %58 = vector.shape_cast %57 : vector<1x16x128xf32> to vector<16x128xf32>
    %59 = vector.shape_cast %56 : vector<16x128xf32> to vector<1x16x128xf32>
    tpu.vector_store %arg13[%c3_43, %c0_44, %c0_45], %59 {strides = array<i32>} : memref<8x16x128xf32, #tpu.memory_space<vmem>>, vector<1x16x128xf32>,
    %c4 = arith.constant 4 : index
    %c0_46 = arith.constant 0 : index
    %c0_47 = arith.constant 0 : index
    %60 = vector.load %arg1[%c4, %c0_46, %c0_47] : memref<8x16x16xbf16, #tpu.memory_space<vmem>>, vector<1x16x16xbf16>
    %61 = vector.shape_cast %60 : vector<1x16x16xbf16> to vector<16x16xbf16>
    %cst_48 = arith.constant dense<0.000000e+00> : vector<16x128xf32>
    %62 = tpu.matmul %61, %0, %cst_48 {dimension_numbers = #tpu.dot_dimension_numbers<[1], [0], [0], [1], [0, 0, 1, 1], [], []>} : vector<16x16xbf16>, vector<16x128xbf16>, vector<16x128xf32> -> vector<16x128xf32>
    %63 = arith.addf %62, %5 : vector<16x128xf32>
    %cst_49 = arith.constant 0.000000e+00 : f32
    %64 = vector.broadcast %cst_49 : f32 to vector<16x128xf32>
    %65 = arith.maximumf %63, %64 : vector<16x128xf32>
    %66 = arith.truncf %65 : vector<16x128xf32> to vector<16x128xbf16>
    %cst_50 = arith.constant dense<0.000000e+00> : vector<16x128xf32>
    %67 = tpu.matmul %66, %1, %cst_50 {dimension_numbers = #tpu.dot_dimension_numbers<[1], [0], [0], [1], [0, 0, 1, 1], [], []>} : vector<16x128xbf16>, vector<128x128xbf16>, vector<16x128xf32> -> vector<16x128xf32>
    %c4_51 = arith.constant 4 : index
    %c0_52 = arith.constant 0 : index
    %c0_53 = arith.constant 0 : index
    %68 = vector.load %arg13[%c4_51, %c0_52, %c0_53] : memref<8x16x128xf32, #tpu.memory_space<vmem>>, vector<1x16x128xf32>
    %69 = vector.shape_cast %68 : vector<1x16x128xf32> to vector<16x128xf32>
    %70 = vector.shape_cast %67 : vector<16x128xf32> to vector<1x16x128xf32>
    tpu.vector_store %arg13[%c4_51, %c0_52, %c0_53], %70 {strides = array<i32>} : memref<8x16x128xf32, #tpu.memory_space<vmem>>, vector<1x16x128xf32>,
    %c5 = arith.constant 5 : index
    %c0_54 = arith.constant 0 : index
    %c0_55 = arith.constant 0 : index
    %71 = vector.load %arg1[%c5, %c0_54, %c0_55] : memref<8x16x16xbf16, #tpu.memory_space<vmem>>, vector<1x16x16xbf16>
    %72 = vector.shape_cast %71 : vector<1x16x16xbf16> to vector<16x16xbf16>
    %cst_56 = arith.constant dense<0.000000e+00> : vector<16x128xf32>
    %73 = tpu.matmul %72, %0, %cst_56 {dimension_numbers = #tpu.dot_dimension_numbers<[1], [0], [0], [1], [0, 0, 1, 1], [], []>} : vector<16x16xbf16>, vector<16x128xbf16>, vector<16x128xf32> -> vector<16x128xf32>
    %74 = arith.addf %73, %5 : vector<16x128xf32>
    %cst_57 = arith.constant 0.000000e+00 : f32
    %75 = vector.broadcast %cst_57 : f32 to vector<16x128xf32>
    %76 = arith.maximumf %74, %75 : vector<16x128xf32>
    %77 = arith.truncf %76 : vector<16x128xf32> to vector<16x128xbf16>
    %cst_58 = arith.constant dense<0.000000e+00> : vector<16x128xf32>
    %78 = tpu.matmul %77, %1, %cst_58 {dimension_numbers = #tpu.dot_dimension_numbers<[1], [0], [0], [1], [0, 0, 1, 1], [], []>} : vector<16x128xbf16>, vector<128x128xbf16>, vector<16x128xf32> -> vector<16x128xf32>
    %c5_59 = arith.constant 5 : index
    %c0_60 = arith.constant 0 : index
    %c0_61 = arith.constant 0 : index
    %79 = vector.load %arg13[%c5_59, %c0_60, %c0_61] : memref<8x16x128xf32, #tpu.memory_space<vmem>>, vector<1x16x128xf32>
    %80 = vector.shape_cast %79 : vector<1x16x128xf32> to vector<16x128xf32>
    %81 = vector.shape_cast %78 : vector<16x128xf32> to vector<1x16x128xf32>
    tpu.vector_store %arg13[%c5_59, %c0_60, %c0_61], %81 {strides = array<i32>} : memref<8x16x128xf32, #tpu.memory_space<vmem>>, vector<1x16x128xf32>,
    %c6 = arith.constant 6 : index
    %c0_62 = arith.constant 0 : index
    %c0_63 = arith.constant 0 : index
    %82 = vector.load %arg1[%c6, %c0_62, %c0_63] : memref<8x16x16xbf16, #tpu.memory_space<vmem>>, vector<1x16x16xbf16>
    %83 = vector.shape_cast %82 : vector<1x16x16xbf16> to vector<16x16xbf16>
    %cst_64 = arith.constant dense<0.000000e+00> : vector<16x128xf32>
    %84 = tpu.matmul %83, %0, %cst_64 {dimension_numbers = #tpu.dot_dimension_numbers<[1], [0], [0], [1], [0, 0, 1, 1], [], []>} : vector<16x16xbf16>, vector<16x128xbf16>, vector<16x128xf32> -> vector<16x128xf32>
    %85 = arith.addf %84, %5 : vector<16x128xf32>
    %cst_65 = arith.constant 0.000000e+00 : f32
    %86 = vector.broadcast %cst_65 : f32 to vector<16x128xf32>
    %87 = arith.maximumf %85, %86 : vector<16x128xf32>
    %88 = arith.truncf %87 : vector<16x128xf32> to vector<16x128xbf16>
    %cst_66 = arith.constant dense<0.000000e+00> : vector<16x128xf32>
    %89 = tpu.matmul %88, %1, %cst_66 {dimension_numbers = #tpu.dot_dimension_numbers<[1], [0], [0], [1], [0, 0, 1, 1], [], []>} : vector<16x128xbf16>, vector<128x128xbf16>, vector<16x128xf32> -> vector<16x128xf32>
    %c6_67 = arith.constant 6 : index
    %c0_68 = arith.constant 0 : index
    %c0_69 = arith.constant 0 : index
    %90 = vector.load %arg13[%c6_67, %c0_68, %c0_69] : memref<8x16x128xf32, #tpu.memory_space<vmem>>, vector<1x16x128xf32>
    %91 = vector.shape_cast %90 : vector<1x16x128xf32> to vector<16x128xf32>
    %92 = vector.shape_cast %89 : vector<16x128xf32> to vector<1x16x128xf32>
    tpu.vector_store %arg13[%c6_67, %c0_68, %c0_69], %92 {strides = array<i32>} : memref<8x16x128xf32, #tpu.memory_space<vmem>>, vector<1x16x128xf32>,
    %c7 = arith.constant 7 : index
    %c0_70 = arith.constant 0 : index
    %c0_71 = arith.constant 0 : index
    %93 = vector.load %arg1[%c7, %c0_70, %c0_71] : memref<8x16x16xbf16, #tpu.memory_space<vmem>>, vector<1x16x16xbf16>
    %94 = vector.shape_cast %93 : vector<1x16x16xbf16> to vector<16x16xbf16>
    %cst_72 = arith.constant dense<0.000000e+00> : vector<16x128xf32>
    %95 = tpu.matmul %94, %0, %cst_72 {dimension_numbers = #tpu.dot_dimension_numbers<[1], [0], [0], [1], [0, 0, 1, 1], [], []>} : vector<16x16xbf16>, vector<16x128xbf16>, vector<16x128xf32> -> vector<16x128xf32>
    %96 = arith.addf %95, %5 : vector<16x128xf32>
    %cst_73 = arith.constant 0.000000e+00 : f32
    %97 = vector.broadcast %cst_73 : f32 to vector<16x128xf32>
    %98 = arith.maximumf %96, %97 : vector<16x128xf32>
    %99 = arith.truncf %98 : vector<16x128xf32> to vector<16x128xbf16>
    %cst_74 = arith.constant dense<0.000000e+00> : vector<16x128xf32>
    %100 = tpu.matmul %99, %1, %cst_74 {dimension_numbers = #tpu.dot_dimension_numbers<[1], [0], [0], [1], [0, 0, 1, 1], [], []>} : vector<16x128xbf16>, vector<128x128xbf16>, vector<16x128xf32> -> vector<16x128xf32>
    %c7_75 = arith.constant 7 : index
    %c0_76 = arith.constant 0 : index
    %c0_77 = arith.constant 0 : index
    %101 = vector.load %arg13[%c7_75, %c0_76, %c0_77] : memref<8x16x128xf32, #tpu.memory_space<vmem>>, vector<1x16x128xf32>
    %102 = vector.shape_cast %101 : vector<1x16x128xf32> to vector<16x128xf32>
    %103 = vector.shape_cast %100 : vector<16x128xf32> to vector<1x16x128xf32>
    tpu.vector_store %arg13[%c7_75, %c0_76, %c0_77], %103 {strides = array<i32>} : memref<8x16x128xf32, #tpu.memory_space<vmem>>, vector<1x16x128xf32>,
    %c0_78 = arith.constant 0 : index
    %c0_79 = arith.constant 0 : index
    %c0_80 = arith.constant 0 : index
    %104 = vector.load %arg13[%c0_78, %c0_79, %c0_80] : memref<8x16x128xf32, #tpu.memory_space<vmem>>, vector<1x16x128xf32>
    %105 = vector.shape_cast %104 : vector<1x16x128xf32> to vector<16x128xf32>
    %106 = arith.truncf %15 : vector<16x128xf32> to vector<16x128xbf16>
    %cst_81 = arith.constant dense<0.000000e+00> : vector<16x128xf32>
    %107 = tpu.matmul %106, %2, %cst_81 {dimension_numbers = #tpu.dot_dimension_numbers<[1], [0], [0], [1], [0, 0, 1, 1], [], []>} : vector<16x128xbf16>, vector<128x128xbf16>, vector<16x128xf32> -> vector<16x128xf32>
    %108 = arith.addf %105, %107 : vector<16x128xf32>
    %109 = arith.addf %108, %8 : vector<16x128xf32>
    %cst_82 = arith.constant dense<0.000000e+00> : vector<16xf32>
    %110 = vector.multi_reduction <add>, %109, %cst_82 [1] : vector<16x128xf32> to vector<16xf32>
    %111 = vector.shape_cast %110 : vector<16xf32> to vector<16x1xf32>
    %112 = arith.mulf %109, %109 : vector<16x128xf32>
    %cst_83 = arith.constant dense<0.000000e+00> : vector<16xf32>
    %113 = vector.multi_reduction <add>, %112, %cst_83 [1] : vector<16x128xf32> to vector<16xf32>
    %114 = vector.shape_cast %113 : vector<16xf32> to vector<16x1xf32>
    %cst_84 = arith.constant 7.812500e-03 : f32
    %115 = vector.broadcast %cst_84 : f32 to vector<16x1xf32>
    %116 = arith.mulf %111, %115 : vector<16x1xf32>
    %cst_85 = arith.constant 7.812500e-03 : f32
    %117 = vector.broadcast %cst_85 : f32 to vector<16x1xf32>
    %118 = arith.mulf %114, %117 : vector<16x1xf32>
    %119 = arith.mulf %116, %116 : vector<16x1xf32>
    %120 = arith.subf %118, %119 : vector<16x1xf32>
    %cst_86 = arith.constant 0.000000e+00 : f32
    %121 = vector.broadcast %cst_86 : f32 to vector<16x1xf32>
    %122 = arith.maximumf %120, %121 : vector<16x1xf32>
    %123 = vector.broadcast %116 : vector<16x1xf32> to vector<16x128xf32>
    %124 = arith.subf %109, %123 : vector<16x128xf32>
    %cst_87 = arith.constant 9.99999974E-6 : f32
    %125 = vector.broadcast %cst_87 : f32 to vector<16x1xf32>
    %126 = arith.addf %122, %125 : vector<16x1xf32>
    %127 = math.rsqrt %126 : vector<16x1xf32>
    %128 = vector.broadcast %127 : vector<16x1xf32> to vector<16x128xf32>
    %129 = arith.mulf %124, %128 : vector<16x128xf32>
    %130 = arith.mulf %129, %11 : vector<16x128xf32>
    %131 = arith.addf %130, %14 : vector<16x128xf32>
    %cst_88 = arith.constant 9.800000e-01 : f32
    %132 = vector.broadcast %cst_88 : f32 to vector<16x128xf32>
    %133 = arith.mulf %132, %15 : vector<16x128xf32>
    %134 = math.tanh %131 : vector<16x128xf32>
    %cst_89 = arith.constant 2.000000e-02 : f32
    %135 = vector.broadcast %cst_89 : f32 to vector<16x128xf32>
    %136 = arith.mulf %135, %134 : vector<16x128xf32>
    %137 = arith.addf %133, %136 : vector<16x128xf32>
    %c1_90 = arith.constant 1 : index
    %c0_91 = arith.constant 0 : index
    %c0_92 = arith.constant 0 : index
    %138 = vector.load %arg13[%c1_90, %c0_91, %c0_92] : memref<8x16x128xf32, #tpu.memory_space<vmem>>, vector<1x16x128xf32>
    %139 = vector.shape_cast %138 : vector<1x16x128xf32> to vector<16x128xf32>
    %140 = arith.truncf %137 : vector<16x128xf32> to vector<16x128xbf16>
    %cst_93 = arith.constant dense<0.000000e+00> : vector<16x128xf32>
    %141 = tpu.matmul %140, %2, %cst_93 {dimension_numbers = #tpu.dot_dimension_numbers<[1], [0], [0], [1], [0, 0, 1, 1], [], []>} : vector<16x128xbf16>, vector<128x128xbf16>, vector<16x128xf32> -> vector<16x128xf32>
    %142 = arith.addf %139, %141 : vector<16x128xf32>
    %143 = arith.addf %142, %8 : vector<16x128xf32>
    %cst_94 = arith.constant dense<0.000000e+00> : vector<16xf32>
    %144 = vector.multi_reduction <add>, %143, %cst_94 [1] : vector<16x128xf32> to vector<16xf32>
    %145 = vector.shape_cast %144 : vector<16xf32> to vector<16x1xf32>
    %146 = arith.mulf %143, %143 : vector<16x128xf32>
    %cst_95 = arith.constant dense<0.000000e+00> : vector<16xf32>
    %147 = vector.multi_reduction <add>, %146, %cst_95 [1] : vector<16x128xf32> to vector<16xf32>
    %148 = vector.shape_cast %147 : vector<16xf32> to vector<16x1xf32>
    %cst_96 = arith.constant 7.812500e-03 : f32
    %149 = vector.broadcast %cst_96 : f32 to vector<16x1xf32>
    %150 = arith.mulf %145, %149 : vector<16x1xf32>
    %cst_97 = arith.constant 7.812500e-03 : f32
    %151 = vector.broadcast %cst_97 : f32 to vector<16x1xf32>
    %152 = arith.mulf %148, %151 : vector<16x1xf32>
    %153 = arith.mulf %150, %150 : vector<16x1xf32>
    %154 = arith.subf %152, %153 : vector<16x1xf32>
    %cst_98 = arith.constant 0.000000e+00 : f32
    %155 = vector.broadcast %cst_98 : f32 to vector<16x1xf32>
    %156 = arith.maximumf %154, %155 : vector<16x1xf32>
    %157 = vector.broadcast %150 : vector<16x1xf32> to vector<16x128xf32>
    %158 = arith.subf %143, %157 : vector<16x128xf32>
    %cst_99 = arith.constant 9.99999974E-6 : f32
    %159 = vector.broadcast %cst_99 : f32 to vector<16x1xf32>
    %160 = arith.addf %156, %159 : vector<16x1xf32>
    %161 = math.rsqrt %160 : vector<16x1xf32>
    %162 = vector.broadcast %161 : vector<16x1xf32> to vector<16x128xf32>
    %163 = arith.mulf %158, %162 : vector<16x128xf32>
    %164 = arith.mulf %163, %11 : vector<16x128xf32>
    %165 = arith.addf %164, %14 : vector<16x128xf32>
    %cst_100 = arith.constant 9.800000e-01 : f32
    %166 = vector.broadcast %cst_100 : f32 to vector<16x128xf32>
    %167 = arith.mulf %166, %137 : vector<16x128xf32>
    %168 = math.tanh %165 : vector<16x128xf32>
    %cst_101 = arith.constant 2.000000e-02 : f32
    %169 = vector.broadcast %cst_101 : f32 to vector<16x128xf32>
    %170 = arith.mulf %169, %168 : vector<16x128xf32>
    %171 = arith.addf %167, %170 : vector<16x128xf32>
    %c2_102 = arith.constant 2 : index
    %c0_103 = arith.constant 0 : index
    %c0_104 = arith.constant 0 : index
    %172 = vector.load %arg13[%c2_102, %c0_103, %c0_104] : memref<8x16x128xf32, #tpu.memory_space<vmem>>, vector<1x16x128xf32>
    %173 = vector.shape_cast %172 : vector<1x16x128xf32> to vector<16x128xf32>
    %174 = arith.truncf %171 : vector<16x128xf32> to vector<16x128xbf16>
    %cst_105 = arith.constant dense<0.000000e+00> : vector<16x128xf32>
    %175 = tpu.matmul %174, %2, %cst_105 {dimension_numbers = #tpu.dot_dimension_numbers<[1], [0], [0], [1], [0, 0, 1, 1], [], []>} : vector<16x128xbf16>, vector<128x128xbf16>, vector<16x128xf32> -> vector<16x128xf32>
    %176 = arith.addf %173, %175 : vector<16x128xf32>
    %177 = arith.addf %176, %8 : vector<16x128xf32>
    %cst_106 = arith.constant dense<0.000000e+00> : vector<16xf32>
    %178 = vector.multi_reduction <add>, %177, %cst_106 [1] : vector<16x128xf32> to vector<16xf32>
    %179 = vector.shape_cast %178 : vector<16xf32> to vector<16x1xf32>
    %180 = arith.mulf %177, %177 : vector<16x128xf32>
    %cst_107 = arith.constant dense<0.000000e+00> : vector<16xf32>
    %181 = vector.multi_reduction <add>, %180, %cst_107 [1] : vector<16x128xf32> to vector<16xf32>
    %182 = vector.shape_cast %181 : vector<16xf32> to vector<16x1xf32>
    %cst_108 = arith.constant 7.812500e-03 : f32
    %183 = vector.broadcast %cst_108 : f32 to vector<16x1xf32>
    %184 = arith.mulf %179, %183 : vector<16x1xf32>
    %cst_109 = arith.constant 7.812500e-03 : f32
    %185 = vector.broadcast %cst_109 : f32 to vector<16x1xf32>
    %186 = arith.mulf %182, %185 : vector<16x1xf32>
    %187 = arith.mulf %184, %184 : vector<16x1xf32>
    %188 = arith.subf %186, %187 : vector<16x1xf32>
    %cst_110 = arith.constant 0.000000e+00 : f32
    %189 = vector.broadcast %cst_110 : f32 to vector<16x1xf32>
    %190 = arith.maximumf %188, %189 : vector<16x1xf32>
    %191 = vector.broadcast %184 : vector<16x1xf32> to vector<16x128xf32>
    %192 = arith.subf %177, %191 : vector<16x128xf32>
    %cst_111 = arith.constant 9.99999974E-6 : f32
    %193 = vector.broadcast %cst_111 : f32 to vector<16x1xf32>
    %194 = arith.addf %190, %193 : vector<16x1xf32>
    %195 = math.rsqrt %194 : vector<16x1xf32>
    %196 = vector.broadcast %195 : vector<16x1xf32> to vector<16x128xf32>
    %197 = arith.mulf %192, %196 : vector<16x128xf32>
    %198 = arith.mulf %197, %11 : vector<16x128xf32>
    %199 = arith.addf %198, %14 : vector<16x128xf32>
    %cst_112 = arith.constant 9.800000e-01 : f32
    %200 = vector.broadcast %cst_112 : f32 to vector<16x128xf32>
    %201 = arith.mulf %200, %171 : vector<16x128xf32>
    %202 = math.tanh %199 : vector<16x128xf32>
    %cst_113 = arith.constant 2.000000e-02 : f32
    %203 = vector.broadcast %cst_113 : f32 to vector<16x128xf32>
    %204 = arith.mulf %203, %202 : vector<16x128xf32>
    %205 = arith.addf %201, %204 : vector<16x128xf32>
    %c3_114 = arith.constant 3 : index
    %c0_115 = arith.constant 0 : index
    %c0_116 = arith.constant 0 : index
    %206 = vector.load %arg13[%c3_114, %c0_115, %c0_116] : memref<8x16x128xf32, #tpu.memory_space<vmem>>, vector<1x16x128xf32>
    %207 = vector.shape_cast %206 : vector<1x16x128xf32> to vector<16x128xf32>
    %208 = arith.truncf %205 : vector<16x128xf32> to vector<16x128xbf16>
    %cst_117 = arith.constant dense<0.000000e+00> : vector<16x128xf32>
    %209 = tpu.matmul %208, %2, %cst_117 {dimension_numbers = #tpu.dot_dimension_numbers<[1], [0], [0], [1], [0, 0, 1, 1], [], []>} : vector<16x128xbf16>, vector<128x128xbf16>, vector<16x128xf32> -> vector<16x128xf32>
    %210 = arith.addf %207, %209 : vector<16x128xf32>
    %211 = arith.addf %210, %8 : vector<16x128xf32>
    %cst_118 = arith.constant dense<0.000000e+00> : vector<16xf32>
    %212 = vector.multi_reduction <add>, %211, %cst_118 [1] : vector<16x128xf32> to vector<16xf32>
    %213 = vector.shape_cast %212 : vector<16xf32> to vector<16x1xf32>
    %214 = arith.mulf %211, %211 : vector<16x128xf32>
    %cst_119 = arith.constant dense<0.000000e+00> : vector<16xf32>
    %215 = vector.multi_reduction <add>, %214, %cst_119 [1] : vector<16x128xf32> to vector<16xf32>
    %216 = vector.shape_cast %215 : vector<16xf32> to vector<16x1xf32>
    %cst_120 = arith.constant 7.812500e-03 : f32
    %217 = vector.broadcast %cst_120 : f32 to vector<16x1xf32>
    %218 = arith.mulf %213, %217 : vector<16x1xf32>
    %cst_121 = arith.constant 7.812500e-03 : f32
    %219 = vector.broadcast %cst_121 : f32 to vector<16x1xf32>
    %220 = arith.mulf %216, %219 : vector<16x1xf32>
    %221 = arith.mulf %218, %218 : vector<16x1xf32>
    %222 = arith.subf %220, %221 : vector<16x1xf32>
    %cst_122 = arith.constant 0.000000e+00 : f32
    %223 = vector.broadcast %cst_122 : f32 to vector<16x1xf32>
    %224 = arith.maximumf %222, %223 : vector<16x1xf32>
    %225 = vector.broadcast %218 : vector<16x1xf32> to vector<16x128xf32>
    %226 = arith.subf %211, %225 : vector<16x128xf32>
    %cst_123 = arith.constant 9.99999974E-6 : f32
    %227 = vector.broadcast %cst_123 : f32 to vector<16x1xf32>
    %228 = arith.addf %224, %227 : vector<16x1xf32>
    %229 = math.rsqrt %228 : vector<16x1xf32>
    %230 = vector.broadcast %229 : vector<16x1xf32> to vector<16x128xf32>
    %231 = arith.mulf %226, %230 : vector<16x128xf32>
    %232 = arith.mulf %231, %11 : vector<16x128xf32>
    %233 = arith.addf %232, %14 : vector<16x128xf32>
    %cst_124 = arith.constant 9.800000e-01 : f32
    %234 = vector.broadcast %cst_124 : f32 to vector<16x128xf32>
    %235 = arith.mulf %234, %205 : vector<16x128xf32>
    %236 = math.tanh %233 : vector<16x128xf32>
    %cst_125 = arith.constant 2.000000e-02 : f32
    %237 = vector.broadcast %cst_125 : f32 to vector<16x128xf32>
    %238 = arith.mulf %237, %236 : vector<16x128xf32>
    %239 = arith.addf %235, %238 : vector<16x128xf32>
    %c4_126 = arith.constant 4 : index
    %c0_127 = arith.constant 0 : index
    %c0_128 = arith.constant 0 : index
    %240 = vector.load %arg13[%c4_126, %c0_127, %c0_128] : memref<8x16x128xf32, #tpu.memory_space<vmem>>, vector<1x16x128xf32>
    %241 = vector.shape_cast %240 : vector<1x16x128xf32> to vector<16x128xf32>
    %242 = arith.truncf %239 : vector<16x128xf32> to vector<16x128xbf16>
    %cst_129 = arith.constant dense<0.000000e+00> : vector<16x128xf32>
    %243 = tpu.matmul %242, %2, %cst_129 {dimension_numbers = #tpu.dot_dimension_numbers<[1], [0], [0], [1], [0, 0, 1, 1], [], []>} : vector<16x128xbf16>, vector<128x128xbf16>, vector<16x128xf32> -> vector<16x128xf32>
    %244 = arith.addf %241, %243 : vector<16x128xf32>
    %245 = arith.addf %244, %8 : vector<16x128xf32>
    %cst_130 = arith.constant dense<0.000000e+00> : vector<16xf32>
    %246 = vector.multi_reduction <add>, %245, %cst_130 [1] : vector<16x128xf32> to vector<16xf32>
    %247 = vector.shape_cast %246 : vector<16xf32> to vector<16x1xf32>
    %248 = arith.mulf %245, %245 : vector<16x128xf32>
    %cst_131 = arith.constant dense<0.000000e+00> : vector<16xf32>
    %249 = vector.multi_reduction <add>, %248, %cst_131 [1] : vector<16x128xf32> to vector<16xf32>
    %250 = vector.shape_cast %249 : vector<16xf32> to vector<16x1xf32>
    %cst_132 = arith.constant 7.812500e-03 : f32
    %251 = vector.broadcast %cst_132 : f32 to vector<16x1xf32>
    %252 = arith.mulf %247, %251 : vector<16x1xf32>
    %cst_133 = arith.constant 7.812500e-03 : f32
    %253 = vector.broadcast %cst_133 : f32 to vector<16x1xf32>
    %254 = arith.mulf %250, %253 : vector<16x1xf32>
    %255 = arith.mulf %252, %252 : vector<16x1xf32>
    %256 = arith.subf %254, %255 : vector<16x1xf32>
    %cst_134 = arith.constant 0.000000e+00 : f32
    %257 = vector.broadcast %cst_134 : f32 to vector<16x1xf32>
    %258 = arith.maximumf %256, %257 : vector<16x1xf32>
    %259 = vector.broadcast %252 : vector<16x1xf32> to vector<16x128xf32>
    %260 = arith.subf %245, %259 : vector<16x128xf32>
    %cst_135 = arith.constant 9.99999974E-6 : f32
    %261 = vector.broadcast %cst_135 : f32 to vector<16x1xf32>
    %262 = arith.addf %258, %261 : vector<16x1xf32>
    %263 = math.rsqrt %262 : vector<16x1xf32>
    %264 = vector.broadcast %263 : vector<16x1xf32> to vector<16x128xf32>
    %265 = arith.mulf %260, %264 : vector<16x128xf32>
    %266 = arith.mulf %265, %11 : vector<16x128xf32>
    %267 = arith.addf %266, %14 : vector<16x128xf32>
    %cst_136 = arith.constant 9.800000e-01 : f32
    %268 = vector.broadcast %cst_136 : f32 to vector<16x128xf32>
    %269 = arith.mulf %268, %239 : vector<16x128xf32>
    %270 = math.tanh %267 : vector<16x128xf32>
    %cst_137 = arith.constant 2.000000e-02 : f32
    %271 = vector.broadcast %cst_137 : f32 to vector<16x128xf32>
    %272 = arith.mulf %271, %270 : vector<16x128xf32>
    %273 = arith.addf %269, %272 : vector<16x128xf32>
    %c5_138 = arith.constant 5 : index
    %c0_139 = arith.constant 0 : index
    %c0_140 = arith.constant 0 : index
    %274 = vector.load %arg13[%c5_138, %c0_139, %c0_140] : memref<8x16x128xf32, #tpu.memory_space<vmem>>, vector<1x16x128xf32>
    %275 = vector.shape_cast %274 : vector<1x16x128xf32> to vector<16x128xf32>
    %276 = arith.truncf %273 : vector<16x128xf32> to vector<16x128xbf16>
    %cst_141 = arith.constant dense<0.000000e+00> : vector<16x128xf32>
    %277 = tpu.matmul %276, %2, %cst_141 {dimension_numbers = #tpu.dot_dimension_numbers<[1], [0], [0], [1], [0, 0, 1, 1], [], []>} : vector<16x128xbf16>, vector<128x128xbf16>, vector<16x128xf32> -> vector<16x128xf32>
    %278 = arith.addf %275, %277 : vector<16x128xf32>
    %279 = arith.addf %278, %8 : vector<16x128xf32>
    %cst_142 = arith.constant dense<0.000000e+00> : vector<16xf32>
    %280 = vector.multi_reduction <add>, %279, %cst_142 [1] : vector<16x128xf32> to vector<16xf32>
    %281 = vector.shape_cast %280 : vector<16xf32> to vector<16x1xf32>
    %282 = arith.mulf %279, %279 : vector<16x128xf32>
    %cst_143 = arith.constant dense<0.000000e+00> : vector<16xf32>
    %283 = vector.multi_reduction <add>, %282, %cst_143 [1] : vector<16x128xf32> to vector<16xf32>
    %284 = vector.shape_cast %283 : vector<16xf32> to vector<16x1xf32>
    %cst_144 = arith.constant 7.812500e-03 : f32
    %285 = vector.broadcast %cst_144 : f32 to vector<16x1xf32>
    %286 = arith.mulf %281, %285 : vector<16x1xf32>
    %cst_145 = arith.constant 7.812500e-03 : f32
    %287 = vector.broadcast %cst_145 : f32 to vector<16x1xf32>
    %288 = arith.mulf %284, %287 : vector<16x1xf32>
    %289 = arith.mulf %286, %286 : vector<16x1xf32>
    %290 = arith.subf %288, %289 : vector<16x1xf32>
    %cst_146 = arith.constant 0.000000e+00 : f32
    %291 = vector.broadcast %cst_146 : f32 to vector<16x1xf32>
    %292 = arith.maximumf %290, %291 : vector<16x1xf32>
    %293 = vector.broadcast %286 : vector<16x1xf32> to vector<16x128xf32>
    %294 = arith.subf %279, %293 : vector<16x128xf32>
    %cst_147 = arith.constant 9.99999974E-6 : f32
    %295 = vector.broadcast %cst_147 : f32 to vector<16x1xf32>
    %296 = arith.addf %292, %295 : vector<16x1xf32>
    %297 = math.rsqrt %296 : vector<16x1xf32>
    %298 = vector.broadcast %297 : vector<16x1xf32> to vector<16x128xf32>
    %299 = arith.mulf %294, %298 : vector<16x128xf32>
    %300 = arith.mulf %299, %11 : vector<16x128xf32>
    %301 = arith.addf %300, %14 : vector<16x128xf32>
    %cst_148 = arith.constant 9.800000e-01 : f32
    %302 = vector.broadcast %cst_148 : f32 to vector<16x128xf32>
    %303 = arith.mulf %302, %273 : vector<16x128xf32>
    %304 = math.tanh %301 : vector<16x128xf32>
    %cst_149 = arith.constant 2.000000e-02 : f32
    %305 = vector.broadcast %cst_149 : f32 to vector<16x128xf32>
    %306 = arith.mulf %305, %304 : vector<16x128xf32>
    %307 = arith.addf %303, %306 : vector<16x128xf32>
    %c6_150 = arith.constant 6 : index
    %c0_151 = arith.constant 0 : index
    %c0_152 = arith.constant 0 : index
    %308 = vector.load %arg13[%c6_150, %c0_151, %c0_152] : memref<8x16x128xf32, #tpu.memory_space<vmem>>, vector<1x16x128xf32>
    %309 = vector.shape_cast %308 : vector<1x16x128xf32> to vector<16x128xf32>
    %310 = arith.truncf %307 : vector<16x128xf32> to vector<16x128xbf16>
    %cst_153 = arith.constant dense<0.000000e+00> : vector<16x128xf32>
    %311 = tpu.matmul %310, %2, %cst_153 {dimension_numbers = #tpu.dot_dimension_numbers<[1], [0], [0], [1], [0, 0, 1, 1], [], []>} : vector<16x128xbf16>, vector<128x128xbf16>, vector<16x128xf32> -> vector<16x128xf32>
    %312 = arith.addf %309, %311 : vector<16x128xf32>
    %313 = arith.addf %312, %8 : vector<16x128xf32>
    %cst_154 = arith.constant dense<0.000000e+00> : vector<16xf32>
    %314 = vector.multi_reduction <add>, %313, %cst_154 [1] : vector<16x128xf32> to vector<16xf32>
    %315 = vector.shape_cast %314 : vector<16xf32> to vector<16x1xf32>
    %316 = arith.mulf %313, %313 : vector<16x128xf32>
    %cst_155 = arith.constant dense<0.000000e+00> : vector<16xf32>
    %317 = vector.multi_reduction <add>, %316, %cst_155 [1] : vector<16x128xf32> to vector<16xf32>
    %318 = vector.shape_cast %317 : vector<16xf32> to vector<16x1xf32>
    %cst_156 = arith.constant 7.812500e-03 : f32
    %319 = vector.broadcast %cst_156 : f32 to vector<16x1xf32>
    %320 = arith.mulf %315, %319 : vector<16x1xf32>
    %cst_157 = arith.constant 7.812500e-03 : f32
    %321 = vector.broadcast %cst_157 : f32 to vector<16x1xf32>
    %322 = arith.mulf %318, %321 : vector<16x1xf32>
    %323 = arith.mulf %320, %320 : vector<16x1xf32>
    %324 = arith.subf %322, %323 : vector<16x1xf32>
    %cst_158 = arith.constant 0.000000e+00 : f32
    %325 = vector.broadcast %cst_158 : f32 to vector<16x1xf32>
    %326 = arith.maximumf %324, %325 : vector<16x1xf32>
    %327 = vector.broadcast %320 : vector<16x1xf32> to vector<16x128xf32>
    %328 = arith.subf %313, %327 : vector<16x128xf32>
    %cst_159 = arith.constant 9.99999974E-6 : f32
    %329 = vector.broadcast %cst_159 : f32 to vector<16x1xf32>
    %330 = arith.addf %326, %329 : vector<16x1xf32>
    %331 = math.rsqrt %330 : vector<16x1xf32>
    %332 = vector.broadcast %331 : vector<16x1xf32> to vector<16x128xf32>
    %333 = arith.mulf %328, %332 : vector<16x128xf32>
    %334 = arith.mulf %333, %11 : vector<16x128xf32>
    %335 = arith.addf %334, %14 : vector<16x128xf32>
    %cst_160 = arith.constant 9.800000e-01 : f32
    %336 = vector.broadcast %cst_160 : f32 to vector<16x128xf32>
    %337 = arith.mulf %336, %307 : vector<16x128xf32>
    %338 = math.tanh %335 : vector<16x128xf32>
    %cst_161 = arith.constant 2.000000e-02 : f32
    %339 = vector.broadcast %cst_161 : f32 to vector<16x128xf32>
    %340 = arith.mulf %339, %338 : vector<16x128xf32>
    %341 = arith.addf %337, %340 : vector<16x128xf32>
    %c7_162 = arith.constant 7 : index
    %c0_163 = arith.constant 0 : index
    %c0_164 = arith.constant 0 : index
    %342 = vector.load %arg13[%c7_162, %c0_163, %c0_164] : memref<8x16x128xf32, #tpu.memory_space<vmem>>, vector<1x16x128xf32>
    %343 = vector.shape_cast %342 : vector<1x16x128xf32> to vector<16x128xf32>
    %344 = arith.truncf %341 : vector<16x128xf32> to vector<16x128xbf16>
    %cst_165 = arith.constant dense<0.000000e+00> : vector<16x128xf32>
    %345 = tpu.matmul %344, %2, %cst_165 {dimension_numbers = #tpu.dot_dimension_numbers<[1], [0], [0], [1], [0, 0, 1, 1], [], []>} : vector<16x128xbf16>, vector<128x128xbf16>, vector<16x128xf32> -> vector<16x128xf32>
    %346 = arith.addf %343, %345 : vector<16x128xf32>
    %347 = arith.addf %346, %8 : vector<16x128xf32>
    %cst_166 = arith.constant dense<0.000000e+00> : vector<16xf32>
    %348 = vector.multi_reduction <add>, %347, %cst_166 [1] : vector<16x128xf32> to vector<16xf32>
    %349 = vector.shape_cast %348 : vector<16xf32> to vector<16x1xf32>
    %350 = arith.mulf %347, %347 : vector<16x128xf32>
    %cst_167 = arith.constant dense<0.000000e+00> : vector<16xf32>
    %351 = vector.multi_reduction <add>, %350, %cst_167 [1] : vector<16x128xf32> to vector<16xf32>
    %352 = vector.shape_cast %351 : vector<16xf32> to vector<16x1xf32>
    %cst_168 = arith.constant 7.812500e-03 : f32
    %353 = vector.broadcast %cst_168 : f32 to vector<16x1xf32>
    %354 = arith.mulf %349, %353 : vector<16x1xf32>
    %cst_169 = arith.constant 7.812500e-03 : f32
    %355 = vector.broadcast %cst_169 : f32 to vector<16x1xf32>
    %356 = arith.mulf %352, %355 : vector<16x1xf32>
    %357 = arith.mulf %354, %354 : vector<16x1xf32>
    %358 = arith.subf %356, %357 : vector<16x1xf32>
    %cst_170 = arith.constant 0.000000e+00 : f32
    %359 = vector.broadcast %cst_170 : f32 to vector<16x1xf32>
    %360 = arith.maximumf %358, %359 : vector<16x1xf32>
    %361 = vector.broadcast %354 : vector<16x1xf32> to vector<16x128xf32>
    %362 = arith.subf %347, %361 : vector<16x128xf32>
    %cst_171 = arith.constant 9.99999974E-6 : f32
    %363 = vector.broadcast %cst_171 : f32 to vector<16x1xf32>
    %364 = arith.addf %360, %363 : vector<16x1xf32>
    %365 = math.rsqrt %364 : vector<16x1xf32>
    %366 = vector.broadcast %365 : vector<16x1xf32> to vector<16x128xf32>
    %367 = arith.mulf %362, %366 : vector<16x128xf32>
    %368 = arith.mulf %367, %11 : vector<16x128xf32>
    %369 = arith.addf %368, %14 : vector<16x128xf32>
    %cst_172 = arith.constant 9.800000e-01 : f32
    %370 = vector.broadcast %cst_172 : f32 to vector<16x128xf32>
    %371 = arith.mulf %370, %341 : vector<16x128xf32>
    %372 = math.tanh %369 : vector<16x128xf32>
    %cst_173 = arith.constant 2.000000e-02 : f32
    %373 = vector.broadcast %cst_173 : f32 to vector<16x128xf32>
    %374 = arith.mulf %373, %372 : vector<16x128xf32>
    %375 = arith.addf %371, %374 : vector<16x128xf32>
    %c0_174 = arith.constant 0 : index
    %c0_175 = arith.constant 0 : index
    %376 = vector.load %arg12[%c0_174, %c0_175] : memref<16x128xf32, #tpu.memory_space<vmem>>, vector<16x128xf32>
    tpu.vector_store %arg12[%c0_174, %c0_175], %375 {strides = array<i32>} : memref<16x128xf32, #tpu.memory_space<vmem>>, vector<16x128xf32>,
    %377 = arith.truncf %375 : vector<16x128xf32> to vector<16x128xbf16>
    %c0_176 = arith.constant 0 : index
    %c0_177 = arith.constant 0 : index
    %378 = vector.load %arg9[%c0_176, %c0_177] : memref<128x128xbf16, #tpu.memory_space<vmem>>, vector<128x128xbf16>
    %cst_178 = arith.constant dense<0.000000e+00> : vector<16x128xf32>
    %379 = tpu.matmul %377, %378, %cst_178 {dimension_numbers = #tpu.dot_dimension_numbers<[1], [0], [0], [1], [0, 0, 1, 1], [], []>} : vector<16x128xbf16>, vector<128x128xbf16>, vector<16x128xf32> -> vector<16x128xf32>
    %c0_179 = arith.constant 0 : index
    %c0_180 = arith.constant 0 : index
    %380 = vector.load %arg10[%c0_179, %c0_180] : memref<1x128xf32, #tpu.memory_space<vmem>>, vector<1x128xf32>
    %381 = vector.broadcast %380 : vector<1x128xf32> to vector<16x128xf32>
    %382 = arith.addf %379, %381 : vector<16x128xf32>
    %c0_181 = arith.constant 0 : index
    %c0_182 = arith.constant 0 : index
    %383 = vector.load %arg11[%c0_181, %c0_182] : memref<16x128xf32, #tpu.memory_space<vmem>>, vector<16x128xf32>
    tpu.vector_store %arg11[%c0_181, %c0_182], %382 {strides = array<i32>} : memref<16x128xf32, #tpu.memory_space<vmem>>, vector<16x128xf32>,
    return
  }
  func.func @transform_0(%arg0: i32) -> (i32, i32, i32) {
    %c0_i32 = arith.constant 0 : i32
    %c0_i32_0 = arith.constant 0 : i32
    %c0_i32_1 = arith.constant 0 : i32
    return %c0_i32, %arg0, %c0_i32_0 : i32, i32, i32
  }
  func.func @transform_1(%arg0: i32) -> (i32, i32) {
    %c0_i32 = arith.constant 0 : i32
    %c0_i32_0 = arith.constant 0 : i32
    %c0_i32_1 = arith.constant 0 : i32
    return %c0_i32, %c0_i32_0 : i32, i32
  }
  func.func @transform_2(%arg0: i32) -> (i32, i32) {
    %c0_i32 = arith.constant 0 : i32
    %c0_i32_0 = arith.constant 0 : i32
    %c0_i32_1 = arith.constant 0 : i32
    return %c0_i32, %c0_i32_0 : i32, i32
  }
  func.func @transform_3(%arg0: i32) -> (i32, i32) {
    %c0_i32 = arith.constant 0 : i32
    %c0_i32_0 = arith.constant 0 : i32
    %c0_i32_1 = arith.constant 0 : i32
    return %c0_i32, %c0_i32_0 : i32, i32
  }
  func.func @transform_4(%arg0: i32) -> (i32, i32) {
    %c0_i32 = arith.constant 0 : i32
    %c0_i32_0 = arith.constant 0 : i32
    %c0_i32_1 = arith.constant 0 : i32
    return %c0_i32, %c0_i32_0 : i32, i32
  }
  func.func @transform_5(%arg0: i32) -> (i32, i32) {
    %c0_i32 = arith.constant 0 : i32
    %c0_i32_0 = arith.constant 0 : i32
    %c0_i32_1 = arith.constant 0 : i32
    return %c0_i32, %c0_i32_0 : i32, i32
  }
  func.func @transform_6(%arg0: i32) -> (i32, i32) {
    %c0_i32 = arith.constant 0 : i32
    %c0_i32_0 = arith.constant 0 : i32
    %c0_i32_1 = arith.constant 0 : i32
    return %c0_i32, %c0_i32_0 : i32, i32
  }
  func.func @transform_7(%arg0: i32) -> (i32, i32) {
    %c0_i32 = arith.constant 0 : i32
    %c0_i32_0 = arith.constant 0 : i32
    %c0_i32_1 = arith.constant 0 : i32
    return %c0_i32, %c0_i32_0 : i32, i32
  }
  func.func @transform_8(%arg0: i32) -> (i32, i32) {
    %c0_i32 = arith.constant 0 : i32
    %c0_i32_0 = arith.constant 0 : i32
    %c0_i32_1 = arith.constant 0 : i32
    return %c0_i32, %c0_i32_0 : i32, i32
  }
  func.func @transform_9(%arg0: i32) -> (i32, i32) {
    %c0_i32 = arith.constant 0 : i32
    %c0_i32_0 = arith.constant 0 : i32
    %c0_i32_1 = arith.constant 0 : i32
    return %c0_i32, %c0_i32_0 : i32, i32
  }
  func.func @transform_10(%arg0: i32) -> (i32, i32) {
    %c0_i32 = arith.constant 0 : i32
    %c0_i32_0 = arith.constant 0 : i32
    return %arg0, %c0_i32 : i32, i32
  }
  func.func @transform_11(%arg0: i32) -> (i32, i32) {
    %c0_i32 = arith.constant 0 : i32
    %c0_i32_0 = arith.constant 0 : i32
    return %arg0, %c0_i32 : i32, i32
  }
}

</mosaic_0001>

<bundles_post_ra>
// kernel: tpu_custom_call.1
= control target key start
LH: loop header
LB: loop body
LE: loop exit
PB: predicated region body
PF: predicated region fallthrough
CT: control target
= control target key end

     0   :  { %17 = vsyncpa [#allocation4], 0  ;;  %s3542_s0 = inlined_call_operand.hbm [shape: bf16[8,16,16], index: 0, kind: input, shape index: {}]   ;;  %s3543_s1 = inlined_call_operand.hbm [shape: bf16[16,128], index: 1, kind: input, shape index: {}]   ;;  %s3544_s2 = inlined_call_operand.vmem [shape: f32[1,128], index: 2, kind: input, shape index: {}]   ;;  %s3545_s3 = inlined_call_operand.hbm [shape: bf16[128,128], index: 3, kind: input, shape index: {}]   ;;  %s3546_s4 = inlined_call_operand.hbm [shape: bf16[128,128], index: 4, kind: input, shape index: {}]   ;;  %s3547_s5 = inlined_call_operand.vmem [shape: f32[1,128], index: 5, kind: input, shape index: {}]   ;;  %s3548_s6 = inlined_call_operand.vmem [shape: f32[1,128], index: 6, kind: input, shape index: {}]   ;;  %s3549_s7 = inlined_call_operand.vmem [shape: f32[1,128], index: 7, kind: input, shape index: {}]   ;;  %s3550_s8 = inlined_call_operand.hbm [shape: bf16[128,128], index: 8, kind: input, shape index: {}]   ;;  %s3551_s9 = inlined_call_operand.vmem [shape: f32[1,128], index: 9, kind: input, shape index: {}]   ;;  %s3552_s10 = inlined_call_operand.hbm [shape: f32[16,128], index: 10, kind: output, shape index: {0}]   ;;  %s3553_s11 = inlined_call_operand.hbm [shape: f32[16,128], index: 11, kind: output, shape index: {1}]  }
   0x1   :  { %18 = vsyncpa [#allocation7], 0 }
   0x2   :  { %19 = vsyncpa [#allocation10], 0 }
   0x3   :  { %20 = vsyncpa [#allocation5], 0 }
   0x4   :  { %21 = vsyncpa [#allocation14], 0  ;;  %s2794_s17 = smov [#allocation6]   ;;  %s2795_s19 = smov [#allocation9]  }
   0x5   :  { %s39_s18 = sshll.u32 %s2794_s17, 4  ;;  %s65_s20 = sshll.u32 %s2795_s19, 4  ;;  %s40_s18 = int_to_ptr.vmem [resolvable:$true] %s39_s18  ;;  %s2868_s20 = int_to_ptr.vmem [resolvable:$true] %s65_s20 }
   0x6   :  { %s2630_s23 = scalar_lea.hbm %s3543_s1, 128 }
   0x7   :  { %p2631_p0 = scmp.ne.s32.totalorder %s3543_s1, %s2630_s23  ;;  %p2634_p1 = scmp.lt.u32.totalorder %s2630_s23, %s3543_s1 }
   0x9   :  { %p2636_p2 = pnand %p2634_p1, %p2631_p0 }
   0xb   :  { %2639 = shalt.err (!%p2636_p2)
}
   0xc   :  { %s2640_s28 = scalar_lea.vmem %s40_s18, 128  ;;  %p2645_p4 = scmp.lt.s32.totalorder %s40_s18, %s40_s18 }
   0xd   :  { %p2641_p3 = scmp.ne.s32.totalorder %s40_s18, %s2640_s28  ;;  %p2646_p5 = scmp.lt.s32.totalorder %s2640_s28, %s2640_s28 }
   0xf   :  { %p2647_p6 = por %p2646_p5, %p2645_p4 }
  0x11   :  { %p2648_p7 = pnand %p2647_p6, %p2641_p3 }
  0x13   :  { %2651 = shalt.err (!%p2648_p7)
}
  0x14   :  { %s2796_s29 = smov 64   ;;  %s2797_s30 = smov 4  }
  0x15   :  { %45 = dma.hbm_to_vmem [thread:$0]  %s3543_s1, 128, %s40_s18, [#allocation7], %s2796_s29, %s2796_s29, %s2797_s30  }
  0x16   :  { %s2652_s16 = scalar_lea.hbm %s3546_s4, 1024 }
  0x17   :  { %p2653_p8 = scmp.ne.s32.totalorder %s3546_s4, %s2652_s16  ;;  %p2656_p9 = scmp.lt.u32.totalorder %s2652_s16, %s3546_s4 }
  0x19   :  { %p2658_p10 = pnand %p2656_p9, %p2653_p8 }
  0x1b   :  { %2661 = shalt.err (!%p2658_p10)
}
  0x1c   :  { %s2662_s23 = scalar_lea.vmem %s2868_s20, 1024  ;;  %p2667_p12 = scmp.lt.s32.totalorder %s2868_s20, %s2868_s20 }
  0x1d   :  { %p2663_p11 = scmp.ne.s32.totalorder %s2868_s20, %s2662_s23  ;;  %p2668_p13 = scmp.lt.s32.totalorder %s2662_s23, %s2662_s23 }
  0x1f   :  { %p2669_p0 = por %p2668_p13, %p2667_p12 }
  0x21   :  { %p2670_p1 = pnand %p2669_p0, %p2663_p11 }
  0x23   :  { %2673 = shalt.err (!%p2670_p1)
}
  0x24   :  { %71 = dma.hbm_to_vmem [thread:$0]  %s3546_s4, 1024, %s2868_s20, [#allocation10], %s2796_s29, %s2796_s29, %s2797_s30  }
  0x25   :  { %s2798_s24 = smov [#allocation3]   ;;  %s2799_s26 = smov [#allocation8]  }
  0x26   :  { %s27_s25 = sshll.u32 %s2798_s24, 4  ;;  %s53_s27 = sshll.u32 %s2799_s26, 4  ;;  %s28_s25 = int_to_ptr.vmem [resolvable:$true] %s27_s25  ;;  %s2905_s27 = int_to_ptr.vmem [resolvable:$true] %s53_s27 }
  0x27   :  { %s2674_s13 = scalar_lea.hbm %s3542_s0, 1024 }
  0x28   :  { %p2675_p2 = scmp.ne.s32.totalorder %s3542_s0, %s2674_s13  ;;  %p2678_p3 = scmp.lt.u32.totalorder %s2674_s13, %s3542_s0 }
  0x2a   :  { %p2680_p4 = pnand %p2678_p3, %p2675_p2 }
  0x2c   :  { %2683 = shalt.err (!%p2680_p4)
}
  0x2d   :  { %s2684_s4 = scalar_lea.vmem %s28_s25, 1024  ;;  %p2689_p6 = scmp.lt.s32.totalorder %s28_s25, %s28_s25 }
  0x2e   :  { %p2685_p5 = scmp.ne.s32.totalorder %s28_s25, %s2684_s4  ;;  %p2690_p7 = scmp.lt.s32.totalorder %s2684_s4, %s2684_s4 }
  0x30   :  { %p2691_p8 = por %p2690_p7, %p2689_p6 }
  0x32   :  { %p2692_p9 = pnand %p2691_p8, %p2685_p5 }
  0x34   :  { %2695 = shalt.err (!%p2692_p9)
}
  0x35   :  { %33 = dma.hbm_to_vmem [thread:$0]  %s3542_s0, 1024, %s28_s25, [#allocation4], %s2796_s29, %s2796_s29, %s2797_s30  }
  0x36   :  { %s2696_s23 = scalar_lea.hbm %s3545_s3, 1024 }
  0x37   :  { %p2697_p10 = scmp.ne.s32.totalorder %s3545_s3, %s2696_s23  ;;  %p2700_p11 = scmp.lt.u32.totalorder %s2696_s23, %s3545_s3 }
  0x39   :  { %p2702_p12 = pnand %p2700_p11, %p2697_p10 }
  0x3b   :  { %2705 = shalt.err (!%p2702_p12)
}
  0x3c   :  { %s2706_s28 = scalar_lea.vmem %s2905_s27, 1024  ;;  %p2711_p0 = scmp.lt.s32.totalorder %s2905_s27, %s2905_s27 }
  0x3d   :  { %p2707_p13 = scmp.ne.s32.totalorder %s2905_s27, %s2706_s28  ;;  %p2712_p1 = scmp.lt.s32.totalorder %s2706_s28, %s2706_s28 }
  0x3f   :  { %p2713_p2 = por %p2712_p1, %p2711_p0 }
  0x41   :  { %p2714_p3 = pnand %p2713_p2, %p2707_p13 }
  0x43   :  { %2717 = shalt.err (!%p2714_p3)
}
  0x44   :  { %59 = dma.hbm_to_vmem [thread:$0]  %s3545_s3, 1024, %s2905_s27, [#allocation7], %s2796_s29, %s2796_s29, %s2797_s30  }
  0x45   :  { %s2800_s12 = smov [#allocation11]   ;;  %s2718_s16 = scalar_lea.hbm %s3550_s8, 1024 }
  0x46   :  { %s83_s13 = sshll.u32 %s2800_s12, 4  ;;  %p2719_p4 = scmp.ne.s32.totalorder %s3550_s8, %s2718_s16  ;;  %s84_s13 = int_to_ptr.vmem [resolvable:$true] %s83_s13 }
  0x47   :  { %p2722_p5 = scmp.lt.u32.totalorder %s2718_s16, %s3550_s8 }
  0x49   :  { %p2724_p6 = pnand %p2722_p5, %p2719_p4 }
  0x4b   :  { %2727 = shalt.err (!%p2724_p6)
}
  0x4c   :  { %s2728_s21 = scalar_lea.vmem %s84_s13, 1024  ;;  %p2733_p8 = scmp.lt.s32.totalorder %s84_s13, %s84_s13 }
  0x4d   :  { %p2729_p7 = scmp.ne.s32.totalorder %s84_s13, %s2728_s21  ;;  %p2734_p9 = scmp.lt.s32.totalorder %s2728_s21, %s2728_s21 }
  0x4f   :  { %p2735_p10 = por %p2734_p9, %p2733_p8 }
  0x51   :  { %p2736_p11 = pnand %p2735_p10, %p2729_p7 }
  0x53   :  { %2739 = shalt.err (!%p2736_p11)
}
  0x54   :  { %89 = dma.hbm_to_vmem [thread:$0]  %s3550_s8, 1024, %s84_s13, [#allocation10], %s2796_s29, %s2796_s29, %s2797_s30  }
  0x55   :  { %2784 = dma.done.wait [#allocation4], 1024  }
  0x56   :  { %2785 = vsyncadd [#allocation4], 4294966272 }
  0x57   :  { %2786 = dma.done.wait [#allocation7], 1152  }
  0x58   :  { %2787 = vsyncadd [#allocation7], 4294966144 }
  0x59   :  { %2788 = dma.done.wait [#allocation10], 2048  }
  0x5a   :  { %2789 = vsyncadd [#allocation10], 4294965248  ;;  %v2801_v0 = vmov 0.0   ;;  %vm2802_vm0 = vmmov 0   ;;  %v2963_v1 = vld [vmem:[#allocation6] sm:$0xff]   ;;  %vm183_vm1 = vcmask 130048  }
  0x5b   :  { %2131 = vmatprep.subr.bf16.mxu0 %v2801_v0  ;;  %2133 = vmatprep.mubr.msk.bf16.mxu0 %vm2802_vm0, %v2801_v0  ;;  %v2534_v2 = vld [vmem:[#allocation3] sm:$0xff]   ;;  %v2967_v3 = vld [vmem:[#allocation8] sm:$0xff]   ;;  %v2971_v4 = vld [vmem:[#allocation8 + $0x8] sm:$0xff]  }
  0x5c   :  { %2137 = vmatprep.subr.bf16.mxu1 %v2801_v0  ;;  %2153 = vmatprep.mubr.msk.bf16.mxu1 %vm2802_vm0, %v2801_v0  ;;  %v2535_v5 = vld [vmem:[#allocation3 + $0x8] sm:$0xff]   ;;  %v2979_v6 = vld [vmem:[#allocation8 + $0x10] sm:$0xff]   ;;  %v2982_v7 = vld [vmem:[#allocation8 + $0x18] sm:$0xff]  }
  0x5d   :  { %2132 = vmatpush3.bf16.msra.mxu0 %v2963_v1  ;;  %2138 = vmatpush3.bf16.msra.mxu1 %v2967_v3  ;;  %v2989_v8 = vld [vmem:[#allocation8 + $0x20] sm:$0xff]   ;;  %v2997_v9 = vld [vmem:[#allocation8 + $0x28] sm:$0xff]   ;;  %v3011_v10 = vld [vmem:[#allocation8 + $0x30] sm:$0xff]  }
  0x5e   :  { %2157 = vmatprep.subr.bf16.mxu0 %v2801_v0  ;;  %2139 = vmatprep.subr.bf16.mxu1 %v2801_v0  ;;  %v3017_v11 = vld [vmem:[#allocation8 + $0x38] sm:$0xff]   ;;  %v2544_v31 = vld [vmem:[#allocation3 + $0x10] sm:$0xff]   ;;  %v2546_v32 = vld [vmem:[#allocation3 + $0x18] sm:$0xff]  }
  0x5f   :  { %v3026_v12 = vld [vmem:[%s3544_s2] ss:$0 sm:$0xff]  ;;  %v2548_v60 = vld [vmem:[#allocation3 + $0x28] sm:$0xff]  }
  0x60   :  { %2134 = vmatmul.mubr.msk.bf16.vlgmr.msra.gmra.mrb[0].mxu0 %vm183_vm1, %v2534_v2  ;;  %v2545_v50 = vld [vmem:[#allocation3 + $0x20] sm:$0xff]  }
  0x61   :  { %2158 = vmatpush3.bf16.msra.mxu0 %v2963_v1  ;;  %2159 = vmatprep.mubr.msk.bf16.mxu0 %vm2802_vm0, %v2801_v0 }
  0x62   :  { %2163 = vmatprep.subr.bf16.mxu0 %v2801_v0  ;;  %2140 = vmatpush3.bf16.msra.mxu1 %v2971_v4 }
  0x63   :  { %2141 = vmatprep.subr.bf16.mxu1 %v2801_v0 }
  0x66   :  { %2142 = vmatpush3.bf16.msra.mxu1 %v2979_v6 }
  0x67   :  { %2143 = vmatprep.subr.bf16.mxu1 %v2801_v0 }
  0x68   :  { %2160 = vmatmul.mubr.msk.bf16.vlgmr.msra.gmra.mrb[4].mxu0 %vm183_vm1, %v2535_v5 }
  0x69   :  { %2164 = vmatpush3.bf16.msra.mxu0 %v2967_v3  ;;  %2179 = vmatprep.mubr.msk.bf16.mxu0 %vm2802_vm0, %v2801_v0 }
  0x6a   :  { %2165 = vmatprep.subr.bf16.mxu0 %v2801_v0  ;;  %2144 = vmatpush3.bf16.msra.mxu1 %v2982_v7 }
  0x6b   :  { %2145 = vmatprep.subr.bf16.mxu1 %v2801_v0 }
  0x6d   :  { %2166 = vmatpush3.bf16.msra.mxu0 %v2971_v4 }
  0x6e   :  { %2167 = vmatprep.subr.bf16.mxu0 %v2801_v0  ;;  %2146 = vmatpush3.bf16.msra.mxu1 %v2989_v8 }
  0x6f   :  { %2147 = vmatprep.subr.bf16.mxu1 %v2801_v0 }
  0x71   :  { %2168 = vmatpush3.bf16.msra.mxu0 %v2979_v6 }
  0x72   :  { %2169 = vmatprep.subr.bf16.mxu0 %v2801_v0  ;;  %2148 = vmatpush3.bf16.msra.mxu1 %v2997_v9 }
  0x73   :  { %2149 = vmatprep.subr.bf16.mxu1 %v2801_v0 }
  0x75   :  { %2170 = vmatpush3.bf16.msra.mxu0 %v2982_v7 }
  0x76   :  { %2171 = vmatprep.subr.bf16.mxu0 %v2801_v0  ;;  %2150 = vmatpush3.bf16.msra.mxu1 %v3011_v10 }
  0x77   :  { %2151 = vmatprep.subr.bf16.mxu1 %v2801_v0 }
  0x79   :  { %2172 = vmatpush3.bf16.msra.mxu0 %v2989_v8 }
  0x7a   :  { %2173 = vmatprep.subr.bf16.mxu0 %v2801_v0  ;;  %2152 = vmatpush3.bf16.msra.mxu1 %v3017_v11 }
  0x7b   :  { %2189 = vmatprep.subr.bf16.mxu1 %v2801_v0 }
  0x7d   :  { %2174 = vmatpush3.bf16.msra.mxu0 %v2997_v9 }
  0x7e   :  { %2175 = vmatprep.subr.bf16.mxu0 %v2801_v0 }
  0x81   :  { %2176 = vmatpush3.bf16.msra.mxu0 %v3011_v10 }
  0x82   :  { %2177 = vmatprep.subr.bf16.mxu0 %v2801_v0 }
  0x85   :  { %2178 = vmatpush3.bf16.msra.mxu0 %v3017_v11 }
  0x86   :  { %2183 = vmatprep.subr.bf16.mxu0 %v2801_v0 }
 0x133   :  { %v221_v13 = vpop.f32.mrb[0].mxu0 }
 0x134   :  { %v222_v14 = vadd.f32 %v3026_v12, %v221_v13  ;;  %v2135_v15 = vpop.f32.mrb[1].mxu0 }
 0x135   :  { %v224_v16 = vpop.f32.mrb[2].mxu0 }
 0x136   :  { %v225_v17 = vadd.f32 %v3026_v12, %v224_v16  ;;  %v2136_v18 = vpop.f32.mrb[3].mxu0  ;;  %v228_v19 = vmax.f32 %v222_v14, 0.0 }
 0x138   :  { %v229_v20 = vmax.f32 %v225_v17, 0.0 }
 0x13a   :  { %v230_v21 = vpack.c.bf16 %v229_v20, %v228_v19 }
 0x13b   :  { %v367_v22 = vpop.f32.mrb[4].mxu0 }
 0x13c   :  { %v368_v23 = vadd.f32 %v3026_v12, %v367_v22  ;;  %2154 = vmatmul.mubr.bf16.vlgmr.msra.gmra.mrb[0].mxu1 %v230_v21  ;;  %v2161_v24 = vpop.f32.mrb[5].mxu0  ;;  %v2547_v21 = vld [vmem:[#allocation3 + $0x30] sm:$0xff]  }
 0x13d   :  { %v370_v25 = vpop.f32.mrb[6].mxu0  ;;  %2190 = vmatpush3.bf16.msra.mxu1 %v2967_v3  ;;  %2205 = vmatprep.mubr.msk.bf16.mxu1 %vm2802_vm0, %v2801_v0 }
 0x13e   :  { %v371_v26 = vadd.f32 %v3026_v12, %v370_v25  ;;  %v2162_v27 = vpop.f32.mrb[7].mxu0  ;;  %2191 = vmatprep.subr.bf16.mxu1 %v2801_v0  ;;  %v374_v28 = vmax.f32 %v368_v23, 0.0 }
 0x140   :  { %v375_v29 = vmax.f32 %v371_v26, 0.0 }
 0x141   :  { %2192 = vmatpush3.bf16.msra.mxu1 %v2971_v4 }
 0x142   :  { %v376_v30 = vpack.c.bf16 %v375_v29, %v374_v28  ;;  %2193 = vmatprep.subr.bf16.mxu1 %v2801_v0 }
 0x144   :  { %2180 = vmatmul.mubr.bf16.vlgmr.msra.gmra.mrb[8].mxu0 %v376_v30 }
 0x145   :  { %2184 = vmatpush3.bf16.msra.mxu0 %v2963_v1  ;;  %2185 = vmatprep.mubr.msk.bf16.mxu0 %vm2802_vm0, %v2801_v0 }
 0x146   :  { %2194 = vmatpush3.bf16.msra.mxu1 %v2979_v6  ;;  %2209 = vmatprep.subr.bf16.mxu0 %v2801_v0 }
 0x147   :  { %2195 = vmatprep.subr.bf16.mxu1 %v2801_v0 }
 0x14a   :  { %2196 = vmatpush3.bf16.msra.mxu1 %v2982_v7 }
 0x14b   :  { %2197 = vmatprep.subr.bf16.mxu1 %v2801_v0 }
 0x14c   :  { %2186 = vmatmul.mubr.msk.bf16.vlgmr.msra.gmra.mrb[12].mxu0 %vm183_vm1, %v2544_v31 }
 0x14d   :  { %2210 = vmatpush3.bf16.msra.mxu0 %v2963_v1  ;;  %2211 = vmatprep.mubr.msk.bf16.mxu0 %vm2802_vm0, %v2801_v0 }
 0x14e   :  { %2198 = vmatpush3.bf16.msra.mxu1 %v2989_v8  ;;  %2215 = vmatprep.subr.bf16.mxu0 %v2801_v0 }
 0x14f   :  { %2199 = vmatprep.subr.bf16.mxu1 %v2801_v0 }
 0x152   :  { %2200 = vmatpush3.bf16.msra.mxu1 %v2997_v9 }
 0x153   :  { %2201 = vmatprep.subr.bf16.mxu1 %v2801_v0 }
 0x154   :  { %2212 = vmatmul.mubr.msk.bf16.vlgmr.msra.gmra.mrb[16].mxu0 %vm183_vm1, %v2546_v32 }
 0x155   :  { %2216 = vmatpush3.bf16.msra.mxu0 %v2967_v3  ;;  %2231 = vmatprep.mubr.msk.bf16.mxu0 %vm2802_vm0, %v2801_v0 }
 0x156   :  { %2202 = vmatpush3.bf16.msra.mxu1 %v3011_v10  ;;  %2217 = vmatprep.subr.bf16.mxu0 %v2801_v0 }
 0x157   :  { %2203 = vmatprep.subr.bf16.mxu1 %v2801_v0 }
 0x159   :  { %2218 = vmatpush3.bf16.msra.mxu0 %v2971_v4 }
 0x15a   :  { %2204 = vmatpush3.bf16.msra.mxu1 %v3017_v11  ;;  %2219 = vmatprep.subr.bf16.mxu0 %v2801_v0 }
 0x15b   :  { %2235 = vmatprep.subr.bf16.mxu1 %v2801_v0 }
 0x15d   :  { %2220 = vmatpush3.bf16.msra.mxu0 %v2979_v6 }
 0x15e   :  { %2221 = vmatprep.subr.bf16.mxu0 %v2801_v0 }
 0x161   :  { %2222 = vmatpush3.bf16.msra.mxu0 %v2982_v7 }
 0x162   :  { %2223 = vmatprep.subr.bf16.mxu0 %v2801_v0 }
 0x165   :  { %2224 = vmatpush3.bf16.msra.mxu0 %v2989_v8 }
 0x166   :  { %2225 = vmatprep.subr.bf16.mxu0 %v2801_v0 }
 0x169   :  { %2226 = vmatpush3.bf16.msra.mxu0 %v2997_v9 }
 0x16a   :  { %2227 = vmatprep.subr.bf16.mxu0 %v2801_v0 }
 0x16d   :  { %2228 = vmatpush3.bf16.msra.mxu0 %v3011_v10 }
 0x16e   :  { %2229 = vmatprep.subr.bf16.mxu0 %v2801_v0 }
 0x171   :  { %2230 = vmatpush3.bf16.msra.mxu0 %v3017_v11 }
 0x172   :  { %2261 = vmatprep.subr.bf16.mxu0 %v2801_v0 }
 0x20f   :  { %v3078_v33 = vpop.f32.mrb[0].mxu1 }
 0x210   :  { %v2155_v34 = vpop.f32.mrb[1].mxu1 }
 0x211   :  { %v3080_v35 = vpop.f32.mrb[2].mxu1 }
 0x212   :  { %v2156_v36 = vpop.f32.mrb[3].mxu1 }
 0x217   :  { %v3082_v37 = vpop.f32.mrb[8].mxu0 }
 0x218   :  { %v2181_v38 = vpop.f32.mrb[9].mxu0 }
 0x219   :  { %v3084_v39 = vpop.f32.mrb[10].mxu0  ;;  %v2557_v38 = vld [vmem:[#allocation3 + $0x38] sm:$0xff]  }
 0x21a   :  { %v2182_v40 = vpop.f32.mrb[11].mxu0 }
 0x21f   :  { %v466_v41 = vpop.f32.mrb[12].mxu0 }
 0x220   :  { %v467_v42 = vadd.f32 %v3026_v12, %v466_v41  ;;  %v2187_v43 = vpop.f32.mrb[13].mxu0 }
 0x221   :  { %v469_v44 = vpop.f32.mrb[14].mxu0 }
 0x222   :  { %v470_v45 = vadd.f32 %v3026_v12, %v469_v44  ;;  %v2188_v46 = vpop.f32.mrb[15].mxu0  ;;  %v473_v47 = vmax.f32 %v467_v42, 0.0  ;;  %v3200_v44 = vld [vmem:[#allocation9] sm:$0xff]  }
 0x223   :  { %v3209_v46 = vld [vmem:[#allocation9 + $0x10] sm:$0xff]  }
 0x224   :  { %v474_v48 = vmax.f32 %v470_v45, 0.0  ;;  %v3203_v45 = vld [vmem:[#allocation9 + $0x8] sm:$0xff]  }
 0x226   :  { %v475_v49 = vpack.c.bf16 %v474_v48, %v473_v47  ;;  %v3213_v47 = vld [vmem:[#allocation9 + $0x18] sm:$0xff]   ;;  %v3217_v48 = vld [vmem:[#allocation9 + $0x20] sm:$0xff]  }
 0x227   :  { %v565_v51 = vpop.f32.mrb[16].mxu0 }
 0x228   :  { %2206 = vmatmul.mubr.bf16.vlgmr.msra.gmra.mrb[4].mxu1 %v475_v49  ;;  %v566_v52 = vadd.f32 %v3026_v12, %v565_v51  ;;  %v2213_v53 = vpop.f32.mrb[17].mxu0  ;;  %v3221_v49 = vld [vmem:[#allocation9 + $0x28] sm:$0xff]   ;;  %v3229_v51 = vld [vmem:[#allocation9 + $0x38] sm:$0xff]  }
 0x229   :  { %2236 = vmatpush3.bf16.msra.mxu1 %v2963_v1  ;;  %2237 = vmatprep.mubr.msk.bf16.mxu1 %vm2802_vm0, %v2801_v0  ;;  %v568_v54 = vpop.f32.mrb[18].mxu0 }
 0x22a   :  { %2241 = vmatprep.subr.bf16.mxu1 %v2801_v0  ;;  %v572_v55 = vmax.f32 %v566_v52, 0.0  ;;  %v569_v56 = vadd.f32 %v3026_v12, %v568_v54  ;;  %v2214_v57 = vpop.f32.mrb[19].mxu0  ;;  %v2803_v52 = vmov 0  }
 0x22c   :  { %v573_v58 = vmax.f32 %v569_v56, 0.0 }
 0x22e   :  { %v574_v59 = vpack.c.bf16 %v573_v58, %v572_v55 }
 0x230   :  { %2238 = vmatmul.mubr.msk.bf16.vlgmr.msra.gmra.mrb[8].mxu1 %vm183_vm1, %v2545_v50  ;;  %2232 = vmatmul.mubr.bf16.vlgmr.msra.gmra.mrb[20].mxu0 %v574_v59  ;;  %v3225_v50 = vld [vmem:[#allocation9 + $0x30] sm:$0xff]  }
 0x231   :  { %2242 = vmatpush3.bf16.msra.mxu1 %v2967_v3  ;;  %2257 = vmatprep.mubr.msk.bf16.mxu1 %vm2802_vm0, %v2801_v0 }
 0x232   :  { %2243 = vmatprep.subr.bf16.mxu1 %v2801_v0  ;;  %2262 = vmatpush3.bf16.msra.mxu0 %v2963_v1 }
 0x233   :  { %2263 = vmatprep.mubr.msk.bf16.mxu0 %vm2802_vm0, %v2801_v0  ;;  %2267 = vmatprep.subr.bf16.mxu0 %v2801_v0 }
 0x235   :  { %2244 = vmatpush3.bf16.msra.mxu1 %v2971_v4 }
 0x236   :  { %2245 = vmatprep.subr.bf16.mxu1 %v2801_v0 }
 0x238   :  { %2264 = vmatmul.mubr.msk.bf16.vlgmr.msra.gmra.mrb[24].mxu0 %vm183_vm1, %v2548_v60 }
 0x239   :  { %2246 = vmatpush3.bf16.msra.mxu1 %v2979_v6  ;;  %2268 = vmatpush3.bf16.msra.mxu0 %v2967_v3 }
 0x23a   :  { %2247 = vmatprep.subr.bf16.mxu1 %v2801_v0  ;;  %2283 = vmatprep.mubr.msk.bf16.mxu0 %vm2802_vm0, %v2801_v0 }
 0x23b   :  { %2269 = vmatprep.subr.bf16.mxu0 %v2801_v0 }
 0x23d   :  { %2248 = vmatpush3.bf16.msra.mxu1 %v2982_v7  ;;  %2270 = vmatpush3.bf16.msra.mxu0 %v2971_v4 }
 0x23e   :  { %2249 = vmatprep.subr.bf16.mxu1 %v2801_v0  ;;  %2271 = vmatprep.subr.bf16.mxu0 %v2801_v0 }
 0x241   :  { %2250 = vmatpush3.bf16.msra.mxu1 %v2989_v8  ;;  %2272 = vmatpush3.bf16.msra.mxu0 %v2979_v6 }
 0x242   :  { %2251 = vmatprep.subr.bf16.mxu1 %v2801_v0  ;;  %2273 = vmatprep.subr.bf16.mxu0 %v2801_v0 }
 0x245   :  { %2252 = vmatpush3.bf16.msra.mxu1 %v2997_v9  ;;  %2274 = vmatpush3.bf16.msra.mxu0 %v2982_v7 }
 0x246   :  { %2253 = vmatprep.subr.bf16.mxu1 %v2801_v0  ;;  %2275 = vmatprep.subr.bf16.mxu0 %v2801_v0 }
 0x249   :  { %2254 = vmatpush3.bf16.msra.mxu1 %v3011_v10  ;;  %2276 = vmatpush3.bf16.msra.mxu0 %v2989_v8 }
 0x24a   :  { %2255 = vmatprep.subr.bf16.mxu1 %v2801_v0  ;;  %2277 = vmatprep.subr.bf16.mxu0 %v2801_v0 }
 0x24d   :  { %2256 = vmatpush3.bf16.msra.mxu1 %v3017_v11  ;;  %2278 = vmatpush3.bf16.msra.mxu0 %v2997_v9 }
 0x24e   :  { %2287 = vmatprep.subr.bf16.mxu1 %v2801_v0  ;;  %2279 = vmatprep.subr.bf16.mxu0 %v2801_v0 }
 0x251   :  { %2280 = vmatpush3.bf16.msra.mxu0 %v3011_v10 }
 0x252   :  { %2281 = vmatprep.subr.bf16.mxu0 %v2801_v0 }
 0x255   :  { %2282 = vmatpush3.bf16.msra.mxu0 %v3017_v11 }
 0x256   :  { %2313 = vmatprep.subr.bf16.mxu0 %v2801_v0 }
 0x2fb   :  { %v3136_v61 = vpop.f32.mrb[4].mxu1 }
 0x2fc   :  { %v2207_v62 = vpop.f32.mrb[5].mxu1 }
 0x2fd   :  { %v3138_v63 = vpop.f32.mrb[6].mxu1  ;;  %v3263_v62 = vld [vmem:[%s3547_s5] ss:$0 sm:$0xff] }
 0x2fe   :  { %v2208_v2 = vpop.f32.mrb[7].mxu1 }
 0x303   :  { %v664_v5 = vpop.f32.mrb[8].mxu1  ;;  %v3165_v22 = vpop.f32.mrb[20].mxu0 }
 0x304   :  { %v665_v13 = vadd.f32 %v3026_v12, %v664_v5  ;;  %v2239_v14 = vpop.f32.mrb[9].mxu1  ;;  %v2233_v23 = vpop.f32.mrb[21].mxu0 }
 0x305   :  { %v667_v15 = vpop.f32.mrb[10].mxu1  ;;  %v3167_v24 = vpop.f32.mrb[22].mxu0 }
 0x306   :  { %v668_v16 = vadd.f32 %v3026_v12, %v667_v15  ;;  %v2240_v17 = vpop.f32.mrb[11].mxu1  ;;  %v671_v18 = vmax.f32 %v665_v13, 0.0  ;;  %v2234_v25 = vpop.f32.mrb[23].mxu0 }
 0x308   :  { %v672_v19 = vmax.f32 %v668_v16, 0.0 }
 0x30a   :  { %v673_v20 = vpack.c.bf16 %v672_v19, %v671_v18 }
 0x30b   :  { %v763_v26 = vpop.f32.mrb[24].mxu0 }
 0x30c   :  { %2258 = vmatmul.mubr.bf16.vlgmr.msra.gmra.mrb[12].mxu1 %v673_v20  ;;  %v764_v27 = vadd.f32 %v3026_v12, %v763_v26  ;;  %v2265_v28 = vpop.f32.mrb[25].mxu0 }
 0x30d   :  { %2288 = vmatpush3.bf16.msra.mxu1 %v2963_v1  ;;  %2289 = vmatprep.mubr.msk.bf16.mxu1 %vm2802_vm0, %v2801_v0  ;;  %v766_v29 = vpop.f32.mrb[26].mxu0 }
 0x30e   :  { %2293 = vmatprep.subr.bf16.mxu1 %v2801_v0  ;;  %v770_v30 = vmax.f32 %v764_v27, 0.0  ;;  %v767_v31 = vadd.f32 %v3026_v12, %v766_v29  ;;  %v2266_v32 = vpop.f32.mrb[27].mxu0 }
 0x310   :  { %v771_v34 = vmax.f32 %v767_v31, 0.0 }
 0x312   :  { %v772_v36 = vpack.c.bf16 %v771_v34, %v770_v30 }
 0x314   :  { %2290 = vmatmul.mubr.msk.bf16.vlgmr.msra.gmra.mrb[16].mxu1 %vm183_vm1, %v2547_v21  ;;  %2284 = vmatmul.mubr.bf16.vlgmr.msra.gmra.mrb[28].mxu0 %v772_v36 }
 0x315   :  { %2294 = vmatpush3.bf16.msra.mxu1 %v2967_v3  ;;  %2309 = vmatprep.mubr.msk.bf16.mxu1 %vm2802_vm0, %v2801_v0 }
 0x316   :  { %2295 = vmatprep.subr.bf16.mxu1 %v2801_v0  ;;  %2314 = vmatpush3.bf16.msra.mxu0 %v2963_v1 }
 0x317   :  { %2315 = vmatprep.mubr.msk.bf16.mxu0 %vm2802_vm0, %v2801_v0  ;;  %2319 = vmatprep.subr.bf16.mxu0 %v2801_v0 }
 0x319   :  { %2296 = vmatpush3.bf16.msra.mxu1 %v2971_v4 }
 0x31a   :  { %2297 = vmatprep.subr.bf16.mxu1 %v2801_v0 }
 0x31c   :  { %2316 = vmatmul.mubr.msk.bf16.vlgmr.msra.gmra.mrb[32].mxu0 %vm183_vm1, %v2557_v38 }
 0x31d   :  { %2298 = vmatpush3.bf16.msra.mxu1 %v2979_v6  ;;  %2320 = vmatpush3.bf16.msra.mxu0 %v2967_v3 }
 0x31e   :  { %2299 = vmatprep.subr.bf16.mxu1 %v2801_v0  ;;  %2335 = vmatprep.mubr.msk.bf16.mxu0 %vm2802_vm0, %v2801_v0 }
 0x31f   :  { %2321 = vmatprep.subr.bf16.mxu0 %v2801_v0 }
 0x321   :  { %2300 = vmatpush3.bf16.msra.mxu1 %v2982_v7  ;;  %2322 = vmatpush3.bf16.msra.mxu0 %v2971_v4 }
 0x322   :  { %2301 = vmatprep.subr.bf16.mxu1 %v2801_v0  ;;  %2323 = vmatprep.subr.bf16.mxu0 %v2801_v0 }
 0x325   :  { %2302 = vmatpush3.bf16.msra.mxu1 %v2989_v8  ;;  %2324 = vmatpush3.bf16.msra.mxu0 %v2979_v6 }
 0x326   :  { %2303 = vmatprep.subr.bf16.mxu1 %v2801_v0  ;;  %2325 = vmatprep.subr.bf16.mxu0 %v2801_v0 }
 0x329   :  { %2304 = vmatpush3.bf16.msra.mxu1 %v2997_v9  ;;  %2326 = vmatpush3.bf16.msra.mxu0 %v2982_v7 }
 0x32a   :  { %2305 = vmatprep.subr.bf16.mxu1 %v2801_v0  ;;  %2327 = vmatprep.subr.bf16.mxu0 %v2801_v0 }
 0x32d   :  { %2306 = vmatpush3.bf16.msra.mxu1 %v3011_v10  ;;  %2328 = vmatpush3.bf16.msra.mxu0 %v2989_v8 }
 0x32e   :  { %2307 = vmatprep.subr.bf16.mxu1 %v2801_v0  ;;  %2329 = vmatprep.subr.bf16.mxu0 %v2801_v0 }
 0x331   :  { %2308 = vmatpush3.bf16.msra.mxu1 %v3017_v11  ;;  %2330 = vmatpush3.bf16.msra.mxu0 %v2997_v9 }
 0x332   :  { %2339 = vmatprep.subr.bf16.mxu1 %v2801_v0  ;;  %2331 = vmatprep.subr.bf16.mxu0 %v2801_v0 }
 0x335   :  { %2332 = vmatpush3.bf16.msra.mxu0 %v3011_v10 }
 0x336   :  { %2333 = vmatprep.subr.bf16.mxu0 %v2801_v0 }
 0x339   :  { %2334 = vmatpush3.bf16.msra.mxu0 %v3017_v11 }
 0x33a   :  { %2359 = vmatprep.subr.bf16.mxu0 %v2801_v0 }
 0x3df   :  { %v3194_v1 = vpop.f32.mrb[12].mxu1 }
 0x3e0   :  { %v2259_v3 = vpop.f32.mrb[13].mxu1 }
 0x3e1   :  { %v3196_v4 = vpop.f32.mrb[14].mxu1 }
 0x3e2   :  { %v2260_v6 = vpop.f32.mrb[15].mxu1 }
 0x3e7   :  { %v862_v7 = vpop.f32.mrb[16].mxu1  ;;  %v3252_v53 = vpop.f32.mrb[28].mxu0 }
 0x3e8   :  { %v863_v8 = vadd.f32 %v3026_v12, %v862_v7  ;;  %v2291_v9 = vpop.f32.mrb[17].mxu1  ;;  %v2285_v54 = vpop.f32.mrb[29].mxu0 }
 0x3e9   :  { %v865_v40 = vpop.f32.mrb[18].mxu1  ;;  %v3254_v55 = vpop.f32.mrb[30].mxu0 }
 0x3ea   :  { %v866_v41 = vadd.f32 %v3026_v12, %v865_v40  ;;  %v2292_v10 = vpop.f32.mrb[19].mxu1  ;;  %v869_v42 = vmax.f32 %v863_v8, 0.0  ;;  %v2286_v56 = vpop.f32.mrb[31].mxu0 }
 0x3eb   :  { %v3297_v56 = vld [vmem:[%s3549_s7] ss:$0 sm:$0xff] }
 0x3ec   :  { %v870_v43 = vmax.f32 %v866_v41, 0.0 }
 0x3ee   :  { %v871_v11 = vpack.c.bf16 %v870_v43, %v869_v42 }
 0x3ef   :  { %v961_v21 = vpop.f32.mrb[32].mxu0 }
 0x3f0   :  { %2310 = vmatmul.mubr.bf16.vlgmr.msra.gmra.mrb[20].mxu1 %v871_v11  ;;  %v2317_v23 = vpop.f32.mrb[33].mxu0 }
 0x3f1   :  { %2340 = vmatpush3.bf16.msra.mxu1 %v3200_v44  ;;  %2355 = vmatprep.mubr.msk.bf16.mxu1 %vm2802_vm0, %v2801_v0  ;;  %v964_v25 = vpop.f32.mrb[34].mxu0 }
 0x3f2   :  { %2341 = vmatprep.subr.bf16.mxu1 %v2801_v0  ;;  %v965_v26 = vadd.f32 %v3026_v12, %v964_v25  ;;  %v2318_v27 = vpop.f32.mrb[35].mxu0 }
 0x3f4   :  { %v969_v29 = vmax.f32 %v965_v26, 0.0 }
 0x3f5   :  { %2342 = vmatpush3.bf16.msra.mxu1 %v3203_v45 }
 0x3f6   :  { %2343 = vmatprep.subr.bf16.mxu1 %v2801_v0 }
 0x3f9   :  { %2344 = vmatpush3.bf16.msra.mxu1 %v3209_v46 }
 0x3fa   :  { %2345 = vmatprep.subr.bf16.mxu1 %v2801_v0 }
 0x3fd   :  { %2346 = vmatpush3.bf16.msra.mxu1 %v3213_v47 }
 0x3fe   :  { %2347 = vmatprep.subr.bf16.mxu1 %v2801_v0 }
 0x401   :  { %2348 = vmatpush3.bf16.msra.mxu1 %v3217_v48 }
 0x402   :  { %2349 = vmatprep.subr.bf16.mxu1 %v2801_v0 }
 0x405   :  { %2350 = vmatpush3.bf16.msra.mxu1 %v3221_v49 }
 0x406   :  { %2351 = vmatprep.subr.bf16.mxu1 %v2801_v0 }
 0x409   :  { %2352 = vmatpush3.bf16.msra.mxu1 %v3225_v50 }
 0x40a   :  { %2353 = vmatprep.subr.bf16.mxu1 %v2801_v0 }
 0x40d   :  { %2354 = vmatpush3.bf16.msra.mxu1 %v3229_v51 }
 0x40e   :  { %2379 = vmatprep.subr.bf16.mxu1 %v2801_v0 }
 0x410   :  { %2356 = vmatmul.mubr.bf16.vlgmr.msra.gmra.mrb[24].mxu1 %v2803_v52  ;;  %v3292_v52 = vld [vmem:[%s3548_s6] ss:$0 sm:$0xff]  ;;  %s2804_s6 = smov [#allocation13]  }
 0x411   :  { %2380 = vmatpush3.bf16.msra.mxu1 %v3200_v44  ;;  %2395 = vmatprep.mubr.msk.bf16.mxu1 %vm2802_vm0, %v2801_v0  ;;  %s1898_s7 = sshll.u32 %s2804_s6, 4  ;;  %s1899_s7 = int_to_ptr.vmem [resolvable:$true] %s1898_s7 }
 0x412   :  { %2381 = vmatprep.subr.bf16.mxu1 %v2801_v0  ;;  %s2740_s18 = scalar_lea.vmem %s1899_s7, 256  ;;  %p2745_p13 = scmp.lt.s32.totalorder %s1899_s7, %s1899_s7 }
 0x413   :  { %p2741_p12 = scmp.ne.s32.totalorder %s1899_s7, %s2740_s18  ;;  %p2746_p0 = scmp.lt.s32.totalorder %s2740_s18, %s2740_s18 }
 0x415   :  { %2382 = vmatpush3.bf16.msra.mxu1 %v3203_v45  ;;  %p2747_p1 = por %p2746_p0, %p2745_p13 }
 0x416   :  { %2383 = vmatprep.subr.bf16.mxu1 %v2801_v0 }
 0x417   :  { %p2748_p2 = pnand %p2747_p1, %p2741_p12 }
 0x419   :  { %2384 = vmatpush3.bf16.msra.mxu1 %v3209_v46 }
 0x41a   :  { %2385 = vmatprep.subr.bf16.mxu1 %v2801_v0 }
 0x41d   :  { %2386 = vmatpush3.bf16.msra.mxu1 %v3213_v47 }
 0x41e   :  { %2387 = vmatprep.subr.bf16.mxu1 %v2801_v0 }
 0x421   :  { %2388 = vmatpush3.bf16.msra.mxu1 %v3217_v48 }
 0x422   :  { %2389 = vmatprep.subr.bf16.mxu1 %v2801_v0 }
 0x425   :  { %2390 = vmatpush3.bf16.msra.mxu1 %v3221_v49 }
 0x426   :  { %2391 = vmatprep.subr.bf16.mxu1 %v2801_v0 }
 0x429   :  { %2392 = vmatpush3.bf16.msra.mxu1 %v3225_v50 }
 0x42a   :  { %2393 = vmatprep.subr.bf16.mxu1 %v2801_v0 }
 0x42d   :  { %2394 = vmatpush3.bf16.msra.mxu1 %v3229_v51 }
 0x42e   :  { %2419 = vmatprep.subr.bf16.mxu1 %v2801_v0 }
 0x4c3   :  { %v3256_v57 = vpop.f32.mrb[20].mxu1 }
 0x4c4   :  { %v2311_v58 = vpop.f32.mrb[21].mxu1 }
 0x4c5   :  { %v3258_v59 = vpop.f32.mrb[22].mxu1 }
 0x4c6   :  { %v2312_v60 = vpop.f32.mrb[23].mxu1 }
 0x4e3   :  { %v1099_v2 = vpop.f32.mrb[24].mxu1 }
 0x4e4   :  { %v1106_v5 = vadd.f32 %v1099_v2, %v3078_v33  ;;  %v2357_v13 = vpop.f32.mrb[25].mxu1  ;;  %v962_v33 = vadd.f32 %v3026_v12, %v961_v21 }
 0x4e5   :  { %v1102_v14 = vpop.f32.mrb[26].mxu1 }
 0x4e6   :  { %v1108_v15 = vadd.f32 %v3263_v62, %v1106_v5  ;;  %v1107_v16 = vadd.f32 %v1102_v14, %v3080_v35  ;;  %v2358_v17 = vpop.f32.mrb[27].mxu1  ;;  %v968_v28 = vmax.f32 %v962_v33, 0.0 }
 0x4e8   :  { %v1109_v18 = vadd.f32 %v3263_v62, %v1107_v16  ;;  %1110 = vadd.xlane.f32.xlu0 %v1108_v15  ;;  %v1114_v19 = vmul.f32 %v1108_v15, %v1108_v15  ;;  %v970_v35 = vpack.c.bf16 %v969_v29, %v968_v28 }
 0x4ea   :  { %1116 = vadd.xlane.f32.xlu1 %v1114_v19  ;;  %v1115_v20 = vmul.f32 %v1109_v18, %v1109_v18  ;;  %2336 = vmatmul.mubr.bf16.vlgmr.msra.gmra.mrb[36].mxu0 %v970_v35 }
 0x4eb   :  { %2360 = vmatpush3.bf16.msra.mxu0 %v3200_v44  ;;  %2375 = vmatprep.mubr.msk.bf16.mxu0 %vm2802_vm0, %v2801_v0 }
 0x4ec   :  { %1112 = vadd.xlane.f32.xlu0 %v1109_v18  ;;  %2361 = vmatprep.subr.bf16.mxu0 %v2801_v0 }
 0x4ee   :  { %1118 = vadd.xlane.f32.xlu1 %v1115_v20 }
 0x4ef   :  { %2362 = vmatpush3.bf16.msra.mxu0 %v3203_v45 }
 0x4f0   :  { %2363 = vmatprep.subr.bf16.mxu0 %v2801_v0 }
 0x4f3   :  { %2364 = vmatpush3.bf16.msra.mxu0 %v3209_v46 }
 0x4f4   :  { %2365 = vmatprep.subr.bf16.mxu0 %v2801_v0 }
 0x4f7   :  { %2366 = vmatpush3.bf16.msra.mxu0 %v3213_v47 }
 0x4f8   :  { %2367 = vmatprep.subr.bf16.mxu0 %v2801_v0 }
 0x4fb   :  { %2368 = vmatpush3.bf16.msra.mxu0 %v3217_v48 }
 0x4fc   :  { %2369 = vmatprep.subr.bf16.mxu0 %v2801_v0 }
 0x4ff   :  { %2370 = vmatpush3.bf16.msra.mxu0 %v3221_v49 }
 0x500   :  { %2371 = vmatprep.subr.bf16.mxu0 %v2801_v0 }
 0x503   :  { %2372 = vmatpush3.bf16.msra.mxu0 %v3225_v50 }
 0x504   :  { %2373 = vmatprep.subr.bf16.mxu0 %v2801_v0 }
 0x507   :  { %2374 = vmatpush3.bf16.msra.mxu0 %v3229_v51 }
 0x508   :  { %2399 = vmatprep.subr.bf16.mxu0 %v2801_v0 }
 0x575   :  { %v1111_v12 = vpop.xlane.xlu0 %1110 }
 0x576   :  { %v1120_v30 = vmul.f32 0.0078125, %v1111_v12 }
 0x577   :  { %v1117_v31 = vpop.xlane.xlu1 %1116 }
 0x578   :  { %v1124_v32 = vmul.f32 %v1120_v30, %v1120_v30  ;;  %v1122_v34 = vmul.f32 0.0078125, %v1117_v31  ;;  %v1130_v43 = vsub.f32 %v1108_v15, %v1120_v30 }
 0x579   :  { %v1113_v36 = vpop.xlane.xlu0 %1112 }
 0x57a   :  { %v1126_v38 = vsub.f32 %v1122_v34, %v1124_v32  ;;  %v1121_v3 = vmul.f32 0.0078125, %v1113_v36 }
 0x57b   :  { %v1119_v6 = vpop.xlane.xlu1 %1118 }
 0x57c   :  { %v1128_v7 = vmax.f32 %v1126_v38, 0.0  ;;  %v1125_v8 = vmul.f32 %v1121_v3, %v1121_v3  ;;  %v1123_v9 = vmul.f32 0.0078125, %v1119_v6  ;;  %v1131_v58 = vsub.f32 %v1109_v18, %v1121_v3 }
 0x57e   :  { %v1132_v40 = vadd.f32 1e-05, %v1128_v7  ;;  %v1127_v41 = vsub.f32 %v1123_v9, %v1125_v8 }
 0x580   :  { %2566 = vrsqrt.f32 %v1132_v40  ;;  %v1129_v10 = vmax.f32 %v1127_v41, 0.0 }
 0x582   :  { %v1133_v42 = vadd.f32 1e-05, %v1129_v10 }
 0x584   :  { %2568 = vrsqrt.f32 %v1133_v42 }
 0x58a   :  { %v2567_v11 = vpop.eup %2566 }
 0x58b   :  { %v1136_v54 = vmul.f32 %v2567_v11, %v1130_v43 }
 0x58d   :  { %v1138_v60 = vmul.f32 %v3292_v52, %v1136_v54 }
 0x58e   :  { %v2569_v2 = vpop.eup %2568 }
 0x58f   :  { %v1137_v5 = vmul.f32 %v2569_v2, %v1131_v58  ;;  %v1140_v13 = vadd.f32 %v3297_v56, %v1138_v60 }
 0x591   :  { %v1139_v14 = vmul.f32 %v3292_v52, %v1137_v5  ;;  %2570 = vtanh.f32 %v1140_v13 }
 0x593   :  { %v1141_v15 = vadd.f32 %v3297_v56, %v1139_v14 }
 0x595   :  { %2572 = vtanh.f32 %v1141_v15 }
 0x59b   :  { %v2571_v16 = vpop.eup %2570 }
 0x59c   :  { %v3303_v19 = vmul.f32 0.02, %v2571_v16 }
 0x59f   :  { %v2573_v17 = vpop.eup %2572 }
 0x5a0   :  { %v3305_v20 = vmul.f32 0.02, %v2573_v17 }
 0x5a2   :  { %v1150_v18 = vpack.c.bf16 %v3305_v20, %v3303_v19 }
 0x5a4   :  { %2376 = vmatmul.mubr.bf16.vlgmr.msra.gmra.mrb[40].mxu0 %v1150_v18 }
 0x5a5   :  { %2400 = vmatpush3.bf16.msra.mxu0 %v3200_v44  ;;  %2415 = vmatprep.mubr.msk.bf16.mxu0 %vm2802_vm0, %v2801_v0 }
 0x5a6   :  { %2401 = vmatprep.subr.bf16.mxu0 %v2801_v0 }
 0x5a9   :  { %2402 = vmatpush3.bf16.msra.mxu0 %v3203_v45 }
 0x5aa   :  { %2403 = vmatprep.subr.bf16.mxu0 %v2801_v0 }
 0x5ad   :  { %2404 = vmatpush3.bf16.msra.mxu0 %v3209_v46 }
 0x5ae   :  { %2405 = vmatprep.subr.bf16.mxu0 %v2801_v0 }
 0x5b1   :  { %2406 = vmatpush3.bf16.msra.mxu0 %v3213_v47 }
 0x5b2   :  { %2407 = vmatprep.subr.bf16.mxu0 %v2801_v0 }
 0x5b5   :  { %2408 = vmatpush3.bf16.msra.mxu0 %v3217_v48 }
 0x5b6   :  { %2409 = vmatprep.subr.bf16.mxu0 %v2801_v0 }
 0x5b9   :  { %2410 = vmatpush3.bf16.msra.mxu0 %v3221_v49 }
 0x5ba   :  { %2411 = vmatprep.subr.bf16.mxu0 %v2801_v0 }
 0x5bd   :  { %2412 = vmatpush3.bf16.msra.mxu0 %v3225_v50  ;;  %v3327_v21 = vpop.f32.mrb[36].mxu0 }
 0x5be   :  { %2413 = vmatprep.subr.bf16.mxu0 %v2801_v0  ;;  %v2337_v23 = vpop.f32.mrb[37].mxu0 }
 0x5bf   :  { %v3329_v25 = vpop.f32.mrb[38].mxu0 }
 0x5c0   :  { %v2338_v33 = vpop.f32.mrb[39].mxu0 }
 0x5c1   :  { %2414 = vmatpush3.bf16.msra.mxu0 %v3229_v51 }
 0x5c2   :  { %2439 = vmatprep.subr.bf16.mxu0 %v2801_v0 }
 0x677   :  { %v1185_v26 = vpop.f32.mrb[40].mxu0 }
 0x678   :  { %v1192_v27 = vadd.f32 %v1185_v26, %v3082_v37  ;;  %v2377_v28 = vpop.f32.mrb[41].mxu0 }
 0x679   :  { %v1188_v29 = vpop.f32.mrb[42].mxu0  ;;  %v1229_v28 = vmul.f32 0.98, %v3305_v20 }
 0x67a   :  { %v1194_v35 = vadd.f32 %v3263_v62, %v1192_v27  ;;  %v1193_v12 = vadd.f32 %v1188_v29, %v3084_v39  ;;  %v2378_v30 = vpop.f32.mrb[43].mxu0  ;;  %v1228_v27 = vmul.f32 0.98, %v3303_v19 }
 0x67c   :  { %v1195_v31 = vadd.f32 %v3263_v62, %v1193_v12  ;;  %1196 = vadd.xlane.f32.xlu0 %v1194_v35  ;;  %v1200_v32 = vmul.f32 %v1194_v35, %v1194_v35 }
 0x67e   :  { %1198 = vadd.xlane.f32.xlu1 %v1195_v31  ;;  %v1201_v34 = vmul.f32 %v1195_v31, %v1195_v31 }
 0x680   :  { %1202 = vadd.xlane.f32.xlu0 %v1200_v32 }
 0x682   :  { %1204 = vadd.xlane.f32.xlu1 %v1201_v34 }
 0x709   :  { %v1197_v36 = vpop.xlane.xlu0 %1196 }
 0x70a   :  { %v1206_v38 = vmul.f32 0.0078125, %v1197_v36 }
 0x70b   :  { %v1199_v3 = vpop.xlane.xlu1 %1198 }
 0x70c   :  { %v1207_v6 = vmul.f32 0.0078125, %v1199_v3  ;;  %v1210_v7 = vmul.f32 %v1206_v38, %v1206_v38  ;;  %v1216_v58 = vsub.f32 %v1194_v35, %v1206_v38 }
 0x70d   :  { %v1203_v37 = vpop.xlane.xlu0 %1202 }
 0x70e   :  { %v1208_v8 = vmul.f32 0.0078125, %v1203_v37  ;;  %v1211_v40 = vmul.f32 %v1207_v6, %v1207_v6  ;;  %v1217_v2 = vsub.f32 %v1195_v31, %v1207_v6 }
 0x70f   :  { %v1205_v9 = vpop.xlane.xlu1 %1204 }
 0x710   :  { %v1212_v41 = vsub.f32 %v1208_v8, %v1210_v7  ;;  %v1209_v39 = vmul.f32 0.0078125, %v1205_v9 }
 0x712   :  { %v1214_v10 = vmax.f32 %v1212_v41, 0.0  ;;  %v1213_v42 = vsub.f32 %v1209_v39, %v1211_v40 }
 0x714   :  { %v1218_v43 = vadd.f32 1e-05, %v1214_v10  ;;  %v1215_v11 = vmax.f32 %v1213_v42, 0.0 }
 0x716   :  { %2574 = vrsqrt.f32 %v1218_v43  ;;  %v1219_v54 = vadd.f32 1e-05, %v1215_v11 }
 0x718   :  { %2576 = vrsqrt.f32 %v1219_v54 }
 0x720   :  { %v2575_v60 = vpop.eup %2574 }
 0x721   :  { %v1222_v5 = vmul.f32 %v2575_v60, %v1216_v58 }
 0x722   :  { %v2577_v13 = vpop.eup %2576 }
 0x723   :  { %v1223_v14 = vmul.f32 %v2577_v13, %v1217_v2  ;;  %v1224_v15 = vmul.f32 %v3292_v52, %v1222_v5 }
 0x725   :  { %v1225_v16 = vmul.f32 %v3292_v52, %v1223_v14  ;;  %v1226_v17 = vadd.f32 %v3297_v56, %v1224_v15 }
 0x727   :  { %v1227_v18 = vadd.f32 %v3297_v56, %v1225_v16  ;;  %2578 = vtanh.f32 %v1226_v17 }
 0x729   :  { %2580 = vtanh.f32 %v1227_v18 }
 0x731   :  { %v2579_v23 = vpop.eup %2578 }
 0x732   :  { %v1232_v33 = vmul.f32 0.02, %v2579_v23 }
 0x733   :  { %v2581_v26 = vpop.eup %2580 }
 0x734   :  { %v1233_v29 = vmul.f32 0.02, %v2581_v26  ;;  %v3341_v35 = vadd.f32 %v1232_v33, %v1228_v27 }
 0x736   :  { %v3343_v12 = vadd.f32 %v1233_v29, %v1229_v28 }
 0x738   :  { %v1238_v30 = vpack.c.bf16 %v3343_v12, %v3341_v35 }
 0x73a   :  { %2396 = vmatmul.mubr.bf16.vlgmr.msra.gmra.mrb[28].mxu1 %v1238_v30  ;;  %v1316_v30 = vmul.f32 0.98, %v3341_v35 }
 0x73b   :  { %2420 = vmatpush3.bf16.msra.mxu1 %v3200_v44  ;;  %2435 = vmatprep.mubr.msk.bf16.mxu1 %vm2802_vm0, %v2801_v0 }
 0x73c   :  { %2421 = vmatprep.subr.bf16.mxu1 %v2801_v0 }
 0x73f   :  { %2422 = vmatpush3.bf16.msra.mxu1 %v3203_v45 }
 0x740   :  { %2423 = vmatprep.subr.bf16.mxu1 %v2801_v0 }
 0x743   :  { %2424 = vmatpush3.bf16.msra.mxu1 %v3209_v46 }
 0x744   :  { %2425 = vmatprep.subr.bf16.mxu1 %v2801_v0 }
 0x747   :  { %2426 = vmatpush3.bf16.msra.mxu1 %v3213_v47 }
 0x748   :  { %2427 = vmatprep.subr.bf16.mxu1 %v2801_v0 }
 0x74b   :  { %2428 = vmatpush3.bf16.msra.mxu1 %v3217_v48 }
 0x74c   :  { %2429 = vmatprep.subr.bf16.mxu1 %v2801_v0 }
 0x74f   :  { %2430 = vmatpush3.bf16.msra.mxu1 %v3221_v49 }
 0x750   :  { %2431 = vmatprep.subr.bf16.mxu1 %v2801_v0 }
 0x753   :  { %2432 = vmatpush3.bf16.msra.mxu1 %v3225_v50 }
 0x754   :  { %2433 = vmatprep.subr.bf16.mxu1 %v2801_v0 }
 0x757   :  { %2434 = vmatpush3.bf16.msra.mxu1 %v3229_v51 }
 0x758   :  { %2459 = vmatprep.subr.bf16.mxu1 %v2801_v0 }
 0x80d   :  { %v1273_v19 = vpop.f32.mrb[28].mxu1 }
 0x80e   :  { %v1280_v20 = vadd.f32 %v1273_v19, %v3136_v61  ;;  %v2397_v31 = vpop.f32.mrb[29].mxu1  ;;  %v1317_v19 = vmul.f32 0.98, %v3343_v12 }
 0x80f   :  { %v1276_v32 = vpop.f32.mrb[30].mxu1 }
 0x810   :  { %v1282_v34 = vadd.f32 %v3263_v62, %v1280_v20  ;;  %v1281_v36 = vadd.f32 %v1276_v32, %v3138_v63  ;;  %v2398_v38 = vpop.f32.mrb[31].mxu1 }
 0x812   :  { %v1283_v3 = vadd.f32 %v3263_v62, %v1281_v36  ;;  %1284 = vadd.xlane.f32.xlu0 %v1282_v34  ;;  %v1288_v6 = vmul.f32 %v1282_v34, %v1282_v34 }
 0x814   :  { %1286 = vadd.xlane.f32.xlu1 %v1283_v3  ;;  %v1289_v37 = vmul.f32 %v1283_v3, %v1283_v3 }
 0x816   :  { %1290 = vadd.xlane.f32.xlu0 %v1288_v6 }
 0x818   :  { %1292 = vadd.xlane.f32.xlu1 %v1289_v37 }
 0x89f   :  { %v1285_v7 = vpop.xlane.xlu0 %1284 }
 0x8a0   :  { %v1294_v8 = vmul.f32 0.0078125, %v1285_v7 }
 0x8a1   :  { %v1287_v9 = vpop.xlane.xlu1 %1286 }
 0x8a2   :  { %v1295_v40 = vmul.f32 0.0078125, %v1287_v9  ;;  %v1298_v41 = vmul.f32 %v1294_v8, %v1294_v8  ;;  %v1304_v5 = vsub.f32 %v1282_v34, %v1294_v8 }
 0x8a3   :  { %v1291_v61 = vpop.xlane.xlu0 %1290 }
 0x8a4   :  { %v1296_v39 = vmul.f32 0.0078125, %v1291_v61  ;;  %v1299_v42 = vmul.f32 %v1295_v40, %v1295_v40  ;;  %v1305_v14 = vsub.f32 %v1283_v3, %v1295_v40 }
 0x8a5   :  { %v1293_v10 = vpop.xlane.xlu1 %1292 }
 0x8a6   :  { %v1300_v43 = vsub.f32 %v1296_v39, %v1298_v41  ;;  %v1297_v63 = vmul.f32 0.0078125, %v1293_v10 }
 0x8a8   :  { %v1302_v11 = vmax.f32 %v1300_v43, 0.0  ;;  %v1301_v54 = vsub.f32 %v1297_v63, %v1299_v42 }
 0x8aa   :  { %v1306_v58 = vadd.f32 1e-05, %v1302_v11  ;;  %v1303_v60 = vmax.f32 %v1301_v54, 0.0 }
 0x8ac   :  { %2582 = vrsqrt.f32 %v1306_v58  ;;  %v1307_v2 = vadd.f32 1e-05, %v1303_v60 }
 0x8ae   :  { %2584 = vrsqrt.f32 %v1307_v2 }
 0x8b6   :  { %v2583_v13 = vpop.eup %2582 }
 0x8b7   :  { %v1310_v15 = vmul.f32 %v2583_v13, %v1304_v5 }
 0x8b8   :  { %v2585_v16 = vpop.eup %2584 }
 0x8b9   :  { %v1311_v17 = vmul.f32 %v2585_v16, %v1305_v14  ;;  %v1312_v18 = vmul.f32 %v3292_v52, %v1310_v15 }
 0x8bb   :  { %v1313_v23 = vmul.f32 %v3292_v52, %v1311_v17  ;;  %v1314_v33 = vadd.f32 %v3297_v56, %v1312_v18 }
 0x8bd   :  { %v1315_v26 = vadd.f32 %v3297_v56, %v1313_v23  ;;  %2586 = vtanh.f32 %v1314_v33 }
 0x8bf   :  { %2588 = vtanh.f32 %v1315_v26 }
 0x8c7   :  { %v2587_v27 = vpop.eup %2586 }
 0x8c8   :  { %v1320_v28 = vmul.f32 0.02, %v2587_v27 }
 0x8c9   :  { %v2589_v29 = vpop.eup %2588 }
 0x8ca   :  { %v1321_v20 = vmul.f32 0.02, %v2589_v29  ;;  %v3375_v31 = vadd.f32 %v1320_v28, %v1316_v30 }
 0x8cc   :  { %v3377_v32 = vadd.f32 %v1321_v20, %v1317_v19  ;;  %v1404_v19 = vmul.f32 0.98, %v3375_v31 }
 0x8ce   :  { %v1326_v34 = vpack.c.bf16 %v3377_v32, %v3375_v31  ;;  %v1405_v20 = vmul.f32 0.98, %v3377_v32 }
 0x8d0   :  { %2416 = vmatmul.mubr.bf16.vlgmr.msra.gmra.mrb[44].mxu0 %v1326_v34 }
 0x8d1   :  { %2440 = vmatpush3.bf16.msra.mxu0 %v3200_v44  ;;  %2455 = vmatprep.mubr.msk.bf16.mxu0 %vm2802_vm0, %v2801_v0 }
 0x8d2   :  { %2441 = vmatprep.subr.bf16.mxu0 %v2801_v0 }
 0x8d5   :  { %2442 = vmatpush3.bf16.msra.mxu0 %v3203_v45 }
 0x8d6   :  { %2443 = vmatprep.subr.bf16.mxu0 %v2801_v0 }
 0x8d9   :  { %2444 = vmatpush3.bf16.msra.mxu0 %v3209_v46 }
 0x8da   :  { %2445 = vmatprep.subr.bf16.mxu0 %v2801_v0 }
 0x8dd   :  { %2446 = vmatpush3.bf16.msra.mxu0 %v3213_v47 }
 0x8de   :  { %2447 = vmatprep.subr.bf16.mxu0 %v2801_v0 }
 0x8e1   :  { %2448 = vmatpush3.bf16.msra.mxu0 %v3217_v48 }
 0x8e2   :  { %2449 = vmatprep.subr.bf16.mxu0 %v2801_v0 }
 0x8e5   :  { %2450 = vmatpush3.bf16.msra.mxu0 %v3221_v49 }
 0x8e6   :  { %2451 = vmatprep.subr.bf16.mxu0 %v2801_v0 }
 0x8e9   :  { %2452 = vmatpush3.bf16.msra.mxu0 %v3225_v50 }
 0x8ea   :  { %2453 = vmatprep.subr.bf16.mxu0 %v2801_v0 }
 0x8ed   :  { %2454 = vmatpush3.bf16.msra.mxu0 %v3229_v51 }
 0x8ee   :  { %2479 = vmatprep.subr.bf16.mxu0 %v2801_v0 }
 0x9a3   :  { %v1361_v35 = vpop.f32.mrb[44].mxu0 }
 0x9a4   :  { %v1368_v12 = vadd.f32 %v1361_v35, %v3165_v22  ;;  %v2417_v36 = vpop.f32.mrb[45].mxu0 }
 0x9a5   :  { %v1364_v38 = vpop.f32.mrb[46].mxu0 }
 0x9a6   :  { %v1370_v3 = vadd.f32 %v3263_v62, %v1368_v12  ;;  %v1369_v6 = vadd.f32 %v1364_v38, %v3167_v24  ;;  %v2418_v37 = vpop.f32.mrb[47].mxu0 }
 0x9a8   :  { %v1371_v7 = vadd.f32 %v3263_v62, %v1369_v6  ;;  %1372 = vadd.xlane.f32.xlu0 %v1370_v3  ;;  %v1376_v8 = vmul.f32 %v1370_v3, %v1370_v3 }
 0x9aa   :  { %1374 = vadd.xlane.f32.xlu1 %v1371_v7  ;;  %v1377_v9 = vmul.f32 %v1371_v7, %v1371_v7 }
 0x9ac   :  { %1378 = vadd.xlane.f32.xlu0 %v1376_v8 }
 0x9ae   :  { %1380 = vadd.xlane.f32.xlu1 %v1377_v9 }
 0xa35   :  { %v1373_v40 = vpop.xlane.xlu0 %1372 }
 0xa36   :  { %v1382_v61 = vmul.f32 0.0078125, %v1373_v40 }
 0xa37   :  { %v1375_v41 = vpop.xlane.xlu1 %1374 }
 0xa38   :  { %v1383_v39 = vmul.f32 0.0078125, %v1375_v41  ;;  %v1386_v10 = vmul.f32 %v1382_v61, %v1382_v61  ;;  %v1392_v13 = vsub.f32 %v1370_v3, %v1382_v61 }
 0xa39   :  { %v1379_v22 = vpop.xlane.xlu0 %1378 }
 0xa3a   :  { %v1384_v42 = vmul.f32 0.0078125, %v1379_v22  ;;  %v1387_v63 = vmul.f32 %v1383_v39, %v1383_v39  ;;  %v1393_v15 = vsub.f32 %v1371_v7, %v1383_v39 }
 0xa3b   :  { %v1381_v43 = vpop.xlane.xlu1 %1380 }
 0xa3c   :  { %v1388_v11 = vsub.f32 %v1384_v42, %v1386_v10  ;;  %v1385_v24 = vmul.f32 0.0078125, %v1381_v43 }
 0xa3e   :  { %v1390_v54 = vmax.f32 %v1388_v11, 0.0  ;;  %v1389_v58 = vsub.f32 %v1385_v24, %v1387_v63 }
 0xa40   :  { %v1394_v60 = vadd.f32 1e-05, %v1390_v54  ;;  %v1391_v2 = vmax.f32 %v1389_v58, 0.0 }
 0xa42   :  { %2590 = vrsqrt.f32 %v1394_v60  ;;  %v1395_v5 = vadd.f32 1e-05, %v1391_v2 }
 0xa44   :  { %2592 = vrsqrt.f32 %v1395_v5 }
 0xa4c   :  { %v2591_v14 = vpop.eup %2590 }
 0xa4d   :  { %v1398_v16 = vmul.f32 %v2591_v14, %v1392_v13 }
 0xa4e   :  { %v2593_v17 = vpop.eup %2592 }
 0xa4f   :  { %v1399_v18 = vmul.f32 %v2593_v17, %v1393_v15  ;;  %v1400_v23 = vmul.f32 %v3292_v52, %v1398_v16 }
 0xa51   :  { %v1401_v33 = vmul.f32 %v3292_v52, %v1399_v18  ;;  %v1402_v26 = vadd.f32 %v3297_v56, %v1400_v23 }
 0xa53   :  { %v1403_v27 = vadd.f32 %v3297_v56, %v1401_v33  ;;  %2594 = vtanh.f32 %v1402_v26 }
 0xa55   :  { %2596 = vtanh.f32 %v1403_v27 }
 0xa5d   :  { %v2595_v28 = vpop.eup %2594 }
 0xa5e   :  { %v1408_v29 = vmul.f32 0.02, %v2595_v28 }
 0xa5f   :  { %v2597_v30 = vpop.eup %2596 }
 0xa60   :  { %v1409_v34 = vmul.f32 0.02, %v2597_v30  ;;  %v3409_v35 = vadd.f32 %v1408_v29, %v1404_v19 }
 0xa62   :  { %v3411_v12 = vadd.f32 %v1409_v34, %v1405_v20  ;;  %v1492_v30 = vmul.f32 0.98, %v3409_v35 }
 0xa64   :  { %v1414_v36 = vpack.c.bf16 %v3411_v12, %v3409_v35  ;;  %v1493_v19 = vmul.f32 0.98, %v3411_v12 }
 0xa66   :  { %2436 = vmatmul.mubr.bf16.vlgmr.msra.gmra.mrb[32].mxu1 %v1414_v36 }
 0xa67   :  { %2460 = vmatpush3.bf16.msra.mxu1 %v3200_v44  ;;  %2475 = vmatprep.mubr.msk.bf16.mxu1 %vm2802_vm0, %v2801_v0 }
 0xa68   :  { %2461 = vmatprep.subr.bf16.mxu1 %v2801_v0 }
 0xa6b   :  { %2462 = vmatpush3.bf16.msra.mxu1 %v3203_v45 }
 0xa6c   :  { %2463 = vmatprep.subr.bf16.mxu1 %v2801_v0 }
 0xa6f   :  { %2464 = vmatpush3.bf16.msra.mxu1 %v3209_v46 }
 0xa70   :  { %2465 = vmatprep.subr.bf16.mxu1 %v2801_v0 }
 0xa73   :  { %2466 = vmatpush3.bf16.msra.mxu1 %v3213_v47 }
 0xa74   :  { %2467 = vmatprep.subr.bf16.mxu1 %v2801_v0 }
 0xa77   :  { %2468 = vmatpush3.bf16.msra.mxu1 %v3217_v48 }
 0xa78   :  { %2469 = vmatprep.subr.bf16.mxu1 %v2801_v0 }
 0xa7b   :  { %2470 = vmatpush3.bf16.msra.mxu1 %v3221_v49 }
 0xa7c   :  { %2471 = vmatprep.subr.bf16.mxu1 %v2801_v0 }
 0xa7f   :  { %2472 = vmatpush3.bf16.msra.mxu1 %v3225_v50 }
 0xa80   :  { %2473 = vmatprep.subr.bf16.mxu1 %v2801_v0 }
 0xa83   :  { %2474 = vmatpush3.bf16.msra.mxu1 %v3229_v51 }
 0xa84   :  { %2499 = vmatprep.subr.bf16.mxu1 %v2801_v0 }
 0xb39   :  { %v1449_v31 = vpop.f32.mrb[32].mxu1 }
 0xb3a   :  { %v1456_v32 = vadd.f32 %v1449_v31, %v3194_v1  ;;  %v2437_v38 = vpop.f32.mrb[33].mxu1 }
 0xb3b   :  { %v1452_v3 = vpop.f32.mrb[34].mxu1 }
 0xb3c   :  { %v1458_v6 = vadd.f32 %v3263_v62, %v1456_v32  ;;  %v1457_v37 = vadd.f32 %v1452_v3, %v3196_v4  ;;  %v2438_v7 = vpop.f32.mrb[35].mxu1 }
 0xb3e   :  { %v1459_v8 = vadd.f32 %v3263_v62, %v1457_v37  ;;  %1460 = vadd.xlane.f32.xlu0 %v1458_v6  ;;  %v1464_v9 = vmul.f32 %v1458_v6, %v1458_v6 }
 0xb40   :  { %1462 = vadd.xlane.f32.xlu1 %v1459_v8  ;;  %v1465_v40 = vmul.f32 %v1459_v8, %v1459_v8 }
 0xb42   :  { %1466 = vadd.xlane.f32.xlu0 %v1464_v9 }
 0xb44   :  { %1468 = vadd.xlane.f32.xlu1 %v1465_v40 }
 0xbcb   :  { %v1461_v61 = vpop.xlane.xlu0 %1460 }
 0xbcc   :  { %v1470_v41 = vmul.f32 0.0078125, %v1461_v61 }
 0xbcd   :  { %v1463_v39 = vpop.xlane.xlu1 %1462 }
 0xbce   :  { %v1471_v22 = vmul.f32 0.0078125, %v1463_v39  ;;  %v1474_v10 = vmul.f32 %v1470_v41, %v1470_v41  ;;  %v1480_v5 = vsub.f32 %v1458_v6, %v1470_v41 }
 0xbcf   :  { %v1467_v1 = vpop.xlane.xlu0 %1466 }
 0xbd0   :  { %v1472_v42 = vmul.f32 0.0078125, %v1467_v1  ;;  %v1475_v63 = vmul.f32 %v1471_v22, %v1471_v22  ;;  %v1481_v14 = vsub.f32 %v1459_v8, %v1471_v22 }
 0xbd1   :  { %v1469_v43 = vpop.xlane.xlu1 %1468 }
 0xbd2   :  { %v1476_v11 = vsub.f32 %v1472_v42, %v1474_v10  ;;  %v1473_v4 = vmul.f32 0.0078125, %v1469_v43 }
 0xbd4   :  { %v1478_v24 = vmax.f32 %v1476_v11, 0.0  ;;  %v1477_v54 = vsub.f32 %v1473_v4, %v1475_v63 }
 0xbd6   :  { %v1482_v58 = vadd.f32 1e-05, %v1478_v24  ;;  %v1479_v60 = vmax.f32 %v1477_v54, 0.0 }
 0xbd8   :  { %2598 = vrsqrt.f32 %v1482_v58  ;;  %v1483_v2 = vadd.f32 1e-05, %v1479_v60 }
 0xbda   :  { %2600 = vrsqrt.f32 %v1483_v2 }
 0xbe2   :  { %v2599_v13 = vpop.eup %2598 }
 0xbe3   :  { %v1486_v15 = vmul.f32 %v2599_v13, %v1480_v5 }
 0xbe4   :  { %v2601_v16 = vpop.eup %2600 }
 0xbe5   :  { %v1487_v17 = vmul.f32 %v2601_v16, %v1481_v14  ;;  %v1488_v18 = vmul.f32 %v3292_v52, %v1486_v15 }
 0xbe7   :  { %v1489_v23 = vmul.f32 %v3292_v52, %v1487_v17  ;;  %v1490_v33 = vadd.f32 %v3297_v56, %v1488_v18 }
 0xbe9   :  { %v1491_v26 = vadd.f32 %v3297_v56, %v1489_v23  ;;  %2602 = vtanh.f32 %v1490_v33 }
 0xbeb   :  { %2604 = vtanh.f32 %v1491_v26 }
 0xbf3   :  { %v2603_v27 = vpop.eup %2602 }
 0xbf4   :  { %v1496_v28 = vmul.f32 0.02, %v2603_v27 }
 0xbf5   :  { %v2605_v29 = vpop.eup %2604 }
 0xbf6   :  { %v1497_v20 = vmul.f32 0.02, %v2605_v29  ;;  %v3443_v34 = vadd.f32 %v1496_v28, %v1492_v30 }
 0xbf8   :  { %v3445_v36 = vadd.f32 %v1497_v20, %v1493_v19  ;;  %v1580_v14 = vmul.f32 0.98, %v3443_v34 }
 0xbfa   :  { %v1502_v31 = vpack.c.bf16 %v3445_v36, %v3443_v34  ;;  %v1581_v15 = vmul.f32 0.98, %v3445_v36 }
 0xbfc   :  { %2456 = vmatmul.mubr.bf16.vlgmr.msra.gmra.mrb[48].mxu0 %v1502_v31 }
 0xbfd   :  { %2480 = vmatpush3.bf16.msra.mxu0 %v3200_v44  ;;  %2495 = vmatprep.mubr.msk.bf16.mxu0 %vm2802_vm0, %v2801_v0 }
 0xbfe   :  { %2481 = vmatprep.subr.bf16.mxu0 %v2801_v0 }
 0xc01   :  { %2482 = vmatpush3.bf16.msra.mxu0 %v3203_v45 }
 0xc02   :  { %2483 = vmatprep.subr.bf16.mxu0 %v2801_v0 }
 0xc05   :  { %2484 = vmatpush3.bf16.msra.mxu0 %v3209_v46 }
 0xc06   :  { %2485 = vmatprep.subr.bf16.mxu0 %v2801_v0 }
 0xc09   :  { %2486 = vmatpush3.bf16.msra.mxu0 %v3213_v47 }
 0xc0a   :  { %2487 = vmatprep.subr.bf16.mxu0 %v2801_v0 }
 0xc0d   :  { %2488 = vmatpush3.bf16.msra.mxu0 %v3217_v48 }
 0xc0e   :  { %2489 = vmatprep.subr.bf16.mxu0 %v2801_v0 }
 0xc11   :  { %2490 = vmatpush3.bf16.msra.mxu0 %v3221_v49 }
 0xc12   :  { %2491 = vmatprep.subr.bf16.mxu0 %v2801_v0 }
 0xc15   :  { %2492 = vmatpush3.bf16.msra.mxu0 %v3225_v50 }
 0xc16   :  { %2493 = vmatprep.subr.bf16.mxu0 %v2801_v0 }
 0xc19   :  { %2494 = vmatpush3.bf16.msra.mxu0 %v3229_v51 }
 0xccf   :  { %v1537_v44 = vpop.f32.mrb[48].mxu0 }
 0xcd0   :  { %v1544_v45 = vadd.f32 %v1537_v44, %v3252_v53  ;;  %v2457_v46 = vpop.f32.mrb[49].mxu0 }
 0xcd1   :  { %v1540_v47 = vpop.f32.mrb[50].mxu0 }
 0xcd2   :  { %v1546_v35 = vadd.f32 %v3263_v62, %v1544_v45  ;;  %v1545_v48 = vadd.f32 %v1540_v47, %v3254_v55  ;;  %v2458_v12 = vpop.f32.mrb[51].mxu0 }
 0xcd4   :  { %v1547_v49 = vadd.f32 %v3263_v62, %v1545_v48  ;;  %1548 = vadd.xlane.f32.xlu0 %v1546_v35  ;;  %v1552_v32 = vmul.f32 %v1546_v35, %v1546_v35 }
 0xcd6   :  { %1550 = vadd.xlane.f32.xlu1 %v1547_v49  ;;  %v1553_v50 = vmul.f32 %v1547_v49, %v1547_v49 }
 0xcd8   :  { %1554 = vadd.xlane.f32.xlu0 %v1552_v32 }
 0xcda   :  { %1556 = vadd.xlane.f32.xlu1 %v1553_v50 }
 0xd61   :  { %v1549_v38 = vpop.xlane.xlu0 %1548 }
 0xd62   :  { %v1558_v51 = vmul.f32 0.0078125, %v1549_v38 }
 0xd63   :  { %v1551_v3 = vpop.xlane.xlu1 %1550 }
 0xd64   :  { %v1559_v6 = vmul.f32 0.0078125, %v1551_v3  ;;  %v1562_v37 = vmul.f32 %v1558_v51, %v1558_v51  ;;  %v1568_v10 = vsub.f32 %v1546_v35, %v1558_v51 }
 0xd65   :  { %v1555_v53 = vpop.xlane.xlu0 %1554 }
 0xd66   :  { %v1560_v7 = vmul.f32 0.0078125, %v1555_v53  ;;  %v1563_v9 = vmul.f32 %v1559_v6, %v1559_v6  ;;  %v1569_v43 = vsub.f32 %v1547_v49, %v1559_v6 }
 0xd67   :  { %v1557_v8 = vpop.xlane.xlu1 %1556 }
 0xd68   :  { %v1564_v40 = vsub.f32 %v1560_v7, %v1562_v37  ;;  %v1561_v55 = vmul.f32 0.0078125, %v1557_v8 }
 0xd6a   :  { %v1566_v61 = vmax.f32 %v1564_v40, 0.0  ;;  %v1565_v41 = vsub.f32 %v1561_v55, %v1563_v9 }
 0xd6c   :  { %v1570_v39 = vadd.f32 1e-05, %v1566_v61  ;;  %v1567_v22 = vmax.f32 %v1565_v41, 0.0 }
 0xd6e   :  { %2606 = vrsqrt.f32 %v1570_v39  ;;  %v1571_v1 = vadd.f32 1e-05, %v1567_v22 }
 0xd70   :  { %2608 = vrsqrt.f32 %v1571_v1 }
 0xd78   :  { %v2607_v42 = vpop.eup %2606 }
 0xd79   :  { %v1574_v63 = vmul.f32 %v2607_v42, %v1568_v10 }
 0xd7a   :  { %v2609_v11 = vpop.eup %2608 }
 0xd7b   :  { %v1575_v4 = vmul.f32 %v2609_v11, %v1569_v43  ;;  %v1576_v24 = vmul.f32 %v3292_v52, %v1574_v63 }
 0xd7d   :  { %v1577_v54 = vmul.f32 %v3292_v52, %v1575_v4  ;;  %v1578_v58 = vadd.f32 %v3297_v56, %v1576_v24 }
 0xd7f   :  { %v1579_v60 = vadd.f32 %v3297_v56, %v1577_v54  ;;  %2610 = vtanh.f32 %v1578_v58 }
 0xd81   :  { %2612 = vtanh.f32 %v1579_v60 }
 0xd89   :  { %v2611_v2 = vpop.eup %2610 }
 0xd8a   :  { %v1584_v5 = vmul.f32 0.02, %v2611_v2 }
 0xd8b   :  { %v2613_v13 = vpop.eup %2612 }
 0xd8c   :  { %v1585_v16 = vmul.f32 0.02, %v2613_v13  ;;  %v1586_v17 = vadd.f32 %v1584_v5, %v1580_v14 }
 0xd8e   :  { %v1587_v18 = vadd.f32 %v1585_v16, %v1581_v15  ;;  %v1668_v10 = vmul.f32 0.98, %v1586_v17 }
 0xd90   :  { %v1590_v23 = vpack.c.bf16 %v1587_v18, %v1586_v17  ;;  %v1669_v42 = vmul.f32 0.98, %v1587_v18  ;;  %v2558_v17 = vld [vmem:[#allocation11] sm:$0xff]   ;;  %v2560_v18 = vld [vmem:[#allocation11 + $0x10] sm:$0xff]  }
 0xd92   :  { %2476 = vmatmul.mubr.bf16.vlgmr.msra.gmra.mrb[36].mxu1 %v1590_v23  ;;  %v2563_v23 = vld [vmem:[#allocation11 + $0x28] sm:$0xff]  }
 0xd93   :  { %2515 = vmatprep.mubr.msk.bf16.mxu1 %vm2802_vm0, %v2801_v0  ;;  %2500 = vmatpush3.bf16.msra.mxu1 %v2558_v17 }
 0xd94   :  { %2501 = vmatprep.subr.bf16.mxu1 %v2801_v0 }
 0xe65   :  { %v1625_v33 = vpop.f32.mrb[36].mxu1 }
 0xe66   :  { %v1632_v26 = vadd.f32 %v1625_v33, %v3256_v57  ;;  %v2477_v27 = vpop.f32.mrb[37].mxu1  ;;  %v2564_v33 = vld [vmem:[#allocation11 + $0x30] sm:$0xff]  }
 0xe67   :  { %v1628_v28 = vpop.f32.mrb[38].mxu1 }
 0xe68   :  { %v1634_v29 = vadd.f32 %v3263_v62, %v1632_v26  ;;  %v1633_v30 = vadd.f32 %v1628_v28, %v3258_v59  ;;  %v2478_v19 = vpop.f32.mrb[39].mxu1  ;;  %v2565_v26 = vld [vmem:[#allocation11 + $0x38] sm:$0xff]  }
 0xe6a   :  { %v1635_v20 = vadd.f32 %v3263_v62, %v1633_v30  ;;  %1636 = vadd.xlane.f32.xlu0 %v1634_v29  ;;  %v1640_v34 = vmul.f32 %v1634_v29, %v1634_v29 }
 0xe6c   :  { %1638 = vadd.xlane.f32.xlu1 %v1635_v20  ;;  %v1641_v36 = vmul.f32 %v1635_v20, %v1635_v20 }
 0xe6e   :  { %1642 = vadd.xlane.f32.xlu0 %v1640_v34 }
 0xe70   :  { %1644 = vadd.xlane.f32.xlu1 %v1641_v36 }
 0xef7   :  { %v1637_v31 = vpop.xlane.xlu0 %1636 }
 0xef8   :  { %v1646_v44 = vmul.f32 0.0078125, %v1637_v31 }
 0xef9   :  { %v1639_v45 = vpop.xlane.xlu1 %1638 }
 0xefa   :  { %v1647_v46 = vmul.f32 0.0078125, %v1639_v45  ;;  %v1650_v47 = vmul.f32 %v1646_v44, %v1646_v44  ;;  %v1656_v6 = vsub.f32 %v1634_v29, %v1646_v44 }
 0xefb   :  { %v1643_v57 = vpop.xlane.xlu0 %1642 }
 0xefc   :  { %v1648_v35 = vmul.f32 0.0078125, %v1643_v57  ;;  %v1651_v12 = vmul.f32 %v1647_v46, %v1647_v46  ;;  %v1657_v37 = vsub.f32 %v1635_v20, %v1647_v46 }
 0xefd   :  { %v1645_v48 = vpop.xlane.xlu1 %1644 }
 0xefe   :  { %v1652_v49 = vsub.f32 %v1648_v35, %v1650_v47  ;;  %v1649_v59 = vmul.f32 0.0078125, %v1645_v48 }
 0xf00   :  { %v1654_v32 = vmax.f32 %v1652_v49, 0.0  ;;  %v1653_v50 = vsub.f32 %v1649_v59, %v1651_v12 }
 0xf02   :  { %v1658_v38 = vadd.f32 1e-05, %v1654_v32  ;;  %v1655_v51 = vmax.f32 %v1653_v50, 0.0 }
 0xf04   :  { %2614 = vrsqrt.f32 %v1658_v38  ;;  %v1659_v3 = vadd.f32 1e-05, %v1655_v51 }
 0xf06   :  { %2616 = vrsqrt.f32 %v1659_v3 }
 0xf0e   :  { %v2615_v53 = vpop.eup %2614 }
 0xf0f   :  { %v1662_v7 = vmul.f32 %v2615_v53, %v1656_v6 }
 0xf10   :  { %v2617_v8 = vpop.eup %2616 }
 0xf11   :  { %v1663_v9 = vmul.f32 %v2617_v8, %v1657_v37  ;;  %v1664_v40 = vmul.f32 %v3292_v52, %v1662_v7 }
 0xf13   :  { %v1665_v55 = vmul.f32 %v3292_v52, %v1663_v9  ;;  %v1666_v61 = vadd.f32 %v3297_v56, %v1664_v40 }
 0xf15   :  { %v1667_v41 = vadd.f32 %v3297_v56, %v1665_v55  ;;  %2618 = vtanh.f32 %v1666_v61 }
 0xf17   :  { %2620 = vtanh.f32 %v1667_v41 }
 0xf1f   :  { %v2619_v39 = vpop.eup %2618 }
 0xf20   :  { %v1672_v22 = vmul.f32 0.02, %v2619_v39 }
 0xf21   :  { %v2621_v1 = vpop.eup %2620 }
 0xf22   :  { %v1673_v43 = vmul.f32 0.02, %v2621_v1  ;;  %v3486_v63 = vadd.f32 %v1672_v22, %v1668_v10 }
 0xf24   :  { %v3488_v11 = vadd.f32 %v1673_v43, %v1669_v42  ;;  %v1756_v37 = vmul.f32 0.98, %v3486_v63 }
 0xf26   :  { %v1678_v4 = vpack.c.bf16 %v3488_v11, %v3486_v63  ;;  %v1757_v9 = vmul.f32 0.98, %v3488_v11 }
 0xf28   :  { %2496 = vmatmul.mubr.bf16.vlgmr.msra.gmra.mrb[52].mxu0 %v1678_v4 }
 0xffb   :  { %v1713_v24 = vpop.f32.mrb[52].mxu0 }
 0xffc   :  { %v1720_v54 = vadd.f32 %v1713_v24, %v3327_v21  ;;  %v2497_v58 = vpop.f32.mrb[53].mxu0  ;;  %v2559_v21 = vld [vmem:[#allocation11 + $0x8] sm:$0xff]  }
 0xffd   :  { %v1716_v60 = vpop.f32.mrb[54].mxu0  ;;  %2502 = vmatpush3.bf16.msra.mxu1 %v2559_v21 }
 0xffe   :  { %v1722_v2 = vadd.f32 %v3263_v62, %v1720_v54  ;;  %v1721_v5 = vadd.f32 %v1716_v60, %v3329_v25  ;;  %v2498_v13 = vpop.f32.mrb[55].mxu0  ;;  %2503 = vmatprep.subr.bf16.mxu1 %v2801_v0  ;;  %v2561_v25 = vld [vmem:[#allocation11 + $0x18] sm:$0xff]  }
0x1000   :  { %v1723_v14 = vadd.f32 %v3263_v62, %v1721_v5  ;;  %1724 = vadd.xlane.f32.xlu0 %v1722_v2  ;;  %v1728_v15 = vmul.f32 %v1722_v2, %v1722_v2  ;;  %v2562_v62 = vld [vmem:[#allocation11 + $0x20] sm:$0xff]  }
0x1001   :  { %2504 = vmatpush3.bf16.msra.mxu1 %v2560_v18 }
0x1002   :  { %1726 = vadd.xlane.f32.xlu1 %v1723_v14  ;;  %v1729_v16 = vmul.f32 %v1723_v14, %v1723_v14  ;;  %2505 = vmatprep.subr.bf16.mxu1 %v2801_v0 }
0x1004   :  { %1730 = vadd.xlane.f32.xlu0 %v1728_v15 }
0x1005   :  { %2506 = vmatpush3.bf16.msra.mxu1 %v2561_v25 }
0x1006   :  { %1732 = vadd.xlane.f32.xlu1 %v1729_v16  ;;  %2507 = vmatprep.subr.bf16.mxu1 %v2801_v0 }
0x1009   :  { %2508 = vmatpush3.bf16.msra.mxu1 %v2562_v62 }
0x100a   :  { %2509 = vmatprep.subr.bf16.mxu1 %v2801_v0 }
0x100d   :  { %2510 = vmatpush3.bf16.msra.mxu1 %v2563_v23 }
0x100e   :  { %2511 = vmatprep.subr.bf16.mxu1 %v2801_v0 }
0x1011   :  { %2512 = vmatpush3.bf16.msra.mxu1 %v2564_v33 }
0x1012   :  { %2513 = vmatprep.subr.bf16.mxu1 %v2801_v0 }
0x1015   :  { %2514 = vmatpush3.bf16.msra.mxu1 %v2565_v26 }
0x108d   :  { %v1725_v27 = vpop.xlane.xlu0 %1724 }
0x108e   :  { %v1734_v28 = vmul.f32 0.0078125, %v1725_v27 }
0x108f   :  { %v1727_v29 = vpop.xlane.xlu1 %1726 }
0x1090   :  { %v1735_v30 = vmul.f32 0.0078125, %v1727_v29  ;;  %v1738_v20 = vmul.f32 %v1734_v28, %v1734_v28  ;;  %v1744_v0 = vsub.f32 %v1722_v2, %v1734_v28 }
0x1091   :  { %v1731_v19 = vpop.xlane.xlu0 %1730 }
0x1092   :  { %v1736_v34 = vmul.f32 0.0078125, %v1731_v19  ;;  %v1739_v31 = vmul.f32 %v1735_v30, %v1735_v30  ;;  %v1745_v49 = vsub.f32 %v1723_v14, %v1735_v30 }
0x1093   :  { %v1733_v36 = vpop.xlane.xlu1 %1732 }
0x1094   :  { %v1740_v44 = vsub.f32 %v1736_v34, %v1738_v20  ;;  %v1737_v45 = vmul.f32 0.0078125, %v1733_v36 }
0x1096   :  { %v1742_v46 = vmax.f32 %v1740_v44, 0.0  ;;  %v1741_v57 = vsub.f32 %v1737_v45, %v1739_v31 }
0x1098   :  { %v1746_v47 = vadd.f32 1e-05, %v1742_v46  ;;  %v1743_v35 = vmax.f32 %v1741_v57, 0.0 }
0x109a   :  { %2622 = vrsqrt.f32 %v1746_v47  ;;  %v1747_v48 = vadd.f32 1e-05, %v1743_v35 }
0x109c   :  { %2624 = vrsqrt.f32 %v1747_v48 }
0x10a4   :  { %v2623_v12 = vpop.eup %2622 }
0x10a5   :  { %v1750_v59 = vmul.f32 %v2623_v12, %v1744_v0 }
0x10a6   :  { %v2625_v32 = vpop.eup %2624 }
0x10a7   :  { %v1752_v50 = vmul.f32 %v3292_v52, %v1750_v59  ;;  %v1751_v38 = vmul.f32 %v2625_v32, %v1745_v49 }
0x10a9   :  { %v1753_v51 = vmul.f32 %v3292_v52, %v1751_v38  ;;  %v1754_v3 = vadd.f32 %v3297_v56, %v1752_v50 }
0x10ab   :  { %v1755_v6 = vadd.f32 %v3297_v56, %v1753_v51  ;;  %2626 = vtanh.f32 %v1754_v3 }
0x10ad   :  { %2628 = vtanh.f32 %v1755_v6 }
0x10b5   :  { %v2627_v53 = vpop.eup %2626 }
0x10b6   :  { %v1760_v7 = vmul.f32 0.02, %v2627_v53 }
0x10b7   :  { %v2629_v8 = vpop.eup %2628 }
0x10b8   :  { %v1761_v40 = vmul.f32 0.02, %v2629_v8  ;;  %v1762_v55 = vadd.f32 %v1760_v7, %v1756_v37 }
0x10ba   :  { %v1763_v61 = vadd.f32 %v1761_v40, %v1757_v9  ;;  %1764 = vst [vmem:[#allocation13] sm:$0xff] %v1762_v55 }
0x10bc   :  { %v1766_v41 = vpack.c.bf16 %v1763_v61, %v1762_v55  ;;  %1765 = vst [vmem:[#allocation13 + $0x8] sm:$0xff] %v1763_v61 }
0x10be   :  { %2516 = vmatmul.mubr.bf16.vlgmr.msra.gmra.mrb[40].mxu1 %v1766_v41 }
0x10bf   :  { %2751 = shalt.err (!%p2748_p2)
}
0x10c0   :  { %s2752_s28 = scalar_lea.hbm %s3553_s11, 256 }
0x10c1   :  { %p2753_p3 = scmp.ne.s32.totalorder %s3553_s11, %s2752_s28  ;;  %p2756_p4 = scmp.lt.u32.totalorder %s2752_s28, %s3553_s11 }
0x10c3   :  { %p2758_p5 = pnand %p2756_p4, %p2753_p3 }
0x10c5   :  { %2761 = shalt.err (!%p2758_p5)
}
0x10c6   :  { %s2805_s14 = smov 128   ;;  %s2806_s15 = smov 8   ;;  %v1953_v52 = vld [vmem:[%s3551_s9] ss:$0 sm:$0xff] }
0x10c7   :  { %1904 = dma.vmem_to_hbm [thread:$0]  %s1899_s7, 256, %s3553_s11, [#allocation14], %s2805_s14, %s2805_s14, %s2806_s15  }
0x10c8   :  { %s2807_s19 = smov [#allocation12]  }
0x10c9   :  { %s1886_s21 = sshll.u32 %s2807_s19, 4  ;;  %s1887_s21 = int_to_ptr.vmem [resolvable:$true] %s1886_s21 }
0x10ca   :  { %s2762_s3 = scalar_lea.vmem %s1887_s21, 256  ;;  %p2767_p7 = scmp.lt.s32.totalorder %s1887_s21, %s1887_s21 }
0x10cb   :  { %p2763_p6 = scmp.ne.s32.totalorder %s1887_s21, %s2762_s3  ;;  %p2768_p8 = scmp.lt.s32.totalorder %s2762_s3, %s2762_s3 }
0x10cd   :  { %p2769_p9 = por %p2768_p8, %p2767_p7 }
0x10cf   :  { %p2770_p10 = pnand %p2769_p9, %p2763_p6 }
0x1191   :  { %v1872_v56 = vpop.f32.mrb[40].mxu1 }
0x1192   :  { %v1873_v39 = vadd.f32 %v1953_v52, %v1872_v56  ;;  %v2517_v22 = vpop.f32.mrb[41].mxu1 }
0x1193   :  { %v1875_v1 = vpop.f32.mrb[42].mxu1 }
0x1194   :  { %1879 = vst [vmem:[#allocation12] sm:$0xff] %v1873_v39  ;;  %v1876_v10 = vadd.f32 %v1953_v52, %v1875_v1  ;;  %v2518_v42 = vpop.f32.mrb[43].mxu1 }
0x1196   :  { %1880 = vst [vmem:[#allocation12 + $0x8] sm:$0xff] %v1876_v10 }
0x1197   :  { %2773 = shalt.err (!%p2770_p10)
}
0x1198   :  { %s2774_s27 = scalar_lea.hbm %s3552_s10, 256 }
0x1199   :  { %p2775_p11 = scmp.ne.s32.totalorder %s3552_s10, %s2774_s27  ;;  %p2778_p12 = scmp.lt.u32.totalorder %s2774_s27, %s3552_s10 }
0x119b   :  { %p2780_p13 = pnand %p2778_p12, %p2775_p11 }
0x119d   :  { %2783 = shalt.err (!%p2780_p13)
}
0x119e   :  { %1892 = dma.vmem_to_hbm [thread:$0]  %s1887_s21, 256, %s3552_s10, [#allocation5], %s2805_s14, %s2805_s14, %s2806_s15  }
0x119f   :  { %2790 = dma.done.wait [#allocation5], 256  }
0x11a0   :  { %2791 = vsyncadd [#allocation5], 4294967040 }
0x11a1   :  { %2792 = dma.done.wait [#allocation14], 256  }
0x11a2   :  { %2793 = vsyncadd [#allocation14], 4294967040 }
0x11a3   :  { %1911 = vsyncpa [#allocation4], 1 }
0x11a4   :  { %1912 = vsyncpa [#allocation7], 1 }
0x11a5   :  { %1913 = vsyncpa [#allocation10], 1 }
0x11a6   :  { %1914 = vsyncpa [#allocation5], 1 }
0x11a7   :  { %1915 = vsyncpa [#allocation14], 1 }

</bundles_post_ra>
